<compile_context>
chip_gen: v6e
topology: v6e:2x2x1
jax: 0.10.0
libtpu: 0.0.40
codegen_flags: <defaults>
</compile_context>

<pallas_src>
import functools

import jax
import jax.numpy as jnp
from jax import lax
from jax.experimental import pallas as pl
from jax.experimental.pallas import tpu as pltpu


def _decoder_kernel(x_ref, code_ref, par_ref, mask_ref,
                    w1_ref, s1_ref, t1_ref, w2_ref, s2_ref, t2_ref,
                    out_ref, *, Hp, Wp, Hu, Wu, Cin, Cout, Bt, Zp):
    M = Hu * Wu
    zpad = jnp.zeros((Cin, Zp), jnp.bfloat16)
    ml = mask_ref[0:1, :]            # (1, M) bf16: zero where output col j == 0
    mr = mask_ref[1:2, :]            # (1, M) bf16: zero where output col j == Wu-1
    par = par_ref[...]               # (Hu, Wu, 1) f32: parity code 2*(i%2)+(j%2)

    def up2(v):                      # (Hp, Wp, C) -> (Hu, Wu, C) nearest-neighbour 2x
        c = v.shape[-1]
        v = jnp.broadcast_to(v[:, None, :, :], (Hp, 2, Wp, c)).reshape(Hu, Wp, c)
        v = jnp.broadcast_to(v[:, :, None, :], (Hu, Wp, 2, c)).reshape(Hu, Wu, c)
        return v

    def conv3x3(src_bf, w_ref, s_ref, t_ref):
        # src_bf: (Cin, M) bf16, channels on sublanes, row-major Hu x Wu spatial on lanes.
        flat = jnp.concatenate([zpad, src_bf, zpad], axis=1)      # (Cin, M + 2*Zp)
        rows = []
        for kh in range(3):
            for kw in range(3):
                off = Zp + (kh - 1) * Wu + (kw - 1)
                tap = flat[:, off:off + M]                        # lane-shifted window
                if kw == 0:
                    tap = tap * ml                                # left-edge zero halo
                elif kw == 2:
                    tap = tap * mr                                # right-edge zero halo
                rows.append(tap)
        patches = jnp.concatenate(rows, axis=0)                   # (9*Cin, M) sublane-aligned
        acc = jnp.dot(w_ref[...], patches,
                      preferred_element_type=jnp.float32)         # (C_out, M) lane-dense
        return jnp.maximum(acc * s_ref[...] + t_ref[...], 0.0)    # bias + BN(eval) + ReLU

    for b in range(Bt):              # Bt images per grid step (unrolled)
        # ---- F.max_unpool2d(x, indices, 2, 2, 0, size) as a parity select ----
        # TODO(synk): assumes max_pool2d-produced indices (inside their own 2x2 window);
        #             arbitrary out-of-window indices would need a real scatter.
        xb = x_ref[b]                                             # (Cin, Hp*Wp) f32
        cb = code_ref[b].astype(jnp.int32).astype(jnp.float32)    # (Cin, Hp*Wp)
        xt = jnp.transpose(xb).reshape(Hp, Wp, Cin)               # channels-last select
        ct = jnp.transpose(cb).reshape(Hp, Wp, Cin)
        u = jnp.where(up2(ct) == par, up2(xt), 0.0)               # (Hu, Wu, Cin)
        uT = jnp.transpose(u.reshape(M, Cin)).astype(jnp.bfloat16)  # (Cin, M)

        y1 = conv3x3(uT, w1_ref, s1_ref, t1_ref)                  # (Cin, M) f32
        y2 = conv3x3(y1.astype(jnp.bfloat16), w2_ref, s2_ref, t2_ref)  # (Cout, M) f32
        out_ref[b] = y2


def _pick_block_batch(n):
    """Images per grid step: amortize per-step overhead, keep >= 2 steps for megacore."""
    for bt in (4, 3, 2):
        if n % bt == 0 and n // bt >= 2:
            return bt
    return 1


def decoder_forward(x_nchw, indices_nchw, size, params, block_batch=None):
    """FgSegNet _Decoder forward (n_blocks=2, eval-mode BN).  Returns NCHW features."""
    (w1, b1, g1, be1, rm1, rv1, w2, b2, g2, be2, rm2, rv2) = params
    N, Cin, Hp, Wp = x_nchw.shape
    Hu, Wu = int(size[2]), int(size[3])
    Cout = w2.shape[0]
    assert Hu == 2 * Hp and Wu == 2 * Wp
    M = Hu * Wu
    P = Hp * Wp
    eps = 1e-5
    Bt = block_batch if block_batch is not None else _pick_block_batch(N)
    assert N % Bt == 0
    Zp = ((Wu + 1 + 127) // 128) * 128      # zero-halo width: >= Wu+1, lane aligned

    # Fold conv bias + BatchNorm(eval / running stats) into per-channel scale & shift.
    # TODO(synk): training-mode BN (per-batch statistics) would need a cross-batch
    #             reduction; Dropout (n_blocks==3 path) is identity in eval mode.
    s1 = g1 / jnp.sqrt(rv1 + eps)
    t1 = (b1 - rm1) * s1 + be1
    s2 = g2 / jnp.sqrt(rv2 + eps)
    t2 = (b2 - rm2) * s2 + be2

    # (Cout, Cin, 3, 3) -> (Cout, kh, kw, cin) -> (Cout, 9*Cin); bf16 for the MXU.
    w1_k = jnp.transpose(w1, (0, 2, 3, 1)).reshape(Cin, 9 * Cin).astype(jnp.bfloat16)
    w2_k = jnp.transpose(w2, (0, 2, 3, 1)).reshape(Cout, 9 * Cin).astype(jnp.bfloat16)

    # NCHW consumed directly (free reshape): channels on sublanes, pooled spatial on lanes.
    x_cm = x_nchw.reshape(N, Cin, P).astype(jnp.float32)
    # 1-byte (dh, dw) window-offset code per pooled element.
    dh = (indices_nchw // Wu) % 2
    dw = indices_nchw % 2
    code = (2 * dh + dw).astype(jnp.int8).reshape(N, Cin, P)

    # Tiny grid-invariant tables: unpooled-pixel parity and left/right edge masks.
    ri = (jnp.arange(Hu, dtype=jnp.int32) % 2)[:, None]
    ci = (jnp.arange(Wu, dtype=jnp.int32) % 2)[None, :]
    par = (2 * ri + ci).astype(jnp.float32)[..., None]            # (Hu, Wu, 1)
    col = jnp.arange(M, dtype=jnp.int32) % Wu
    masks = jnp.stack([(col != 0), (col != Wu - 1)]).astype(jnp.bfloat16)  # (2, M)

    kernel = functools.partial(_decoder_kernel, Hp=Hp, Wp=Wp, Hu=Hu, Wu=Wu,
                               Cin=Cin, Cout=Cout, Bt=Bt, Zp=Zp)

    out_flat = pl.pallas_call(
        kernel,
        out_shape=jax.ShapeDtypeStruct((N, Cout, M), jnp.float32),
        grid_spec=pltpu.PrefetchScalarGridSpec(
            num_scalar_prefetch=0,
            grid=(N // Bt,),
            in_specs=[
                pl.BlockSpec((Bt, Cin, P), lambda n: (n, 0, 0)),        # x  (channels-major)
                pl.BlockSpec((Bt, Cin, P), lambda n: (n, 0, 0)),        # (dh,dw) int8 code
                pl.BlockSpec((Hu, Wu, 1), lambda n: (0, 0, 0)),         # parity table
                pl.BlockSpec((2, M), lambda n: (0, 0)),                 # edge masks
                pl.BlockSpec((Cin, 9 * Cin), lambda n: (0, 0)),         # W1^T
                pl.BlockSpec((Cin, 1), lambda n: (0, 0)),               # scale1
                pl.BlockSpec((Cin, 1), lambda n: (0, 0)),               # shift1
                pl.BlockSpec((Cout, 9 * Cin), lambda n: (0, 0)),        # W2^T
                pl.BlockSpec((Cout, 1), lambda n: (0, 0)),              # scale2
                pl.BlockSpec((Cout, 1), lambda n: (0, 0)),              # shift2
            ],
            out_specs=pl.BlockSpec((Bt, Cout, M), lambda n: (n, 0, 0)),  # lane-dense output
        ),
        compiler_params=pltpu.CompilerParams(
            dimension_semantics=("parallel",),       # batch is independent -> 2 TCs on v7x
            vmem_limit_bytes=48 * 1024 * 1024,       # below v7x's 64 MiB physical VMEM
        ),
    )(x_cm, code, par, masks, w1_k, s1.reshape(Cin, 1), t1.reshape(Cin, 1),
      w2_k, s2.reshape(Cout, 1), t2.reshape(Cout, 1))

    return out_flat.reshape(N, Cout, Hu, Wu)         # already NCHW: free reshape


def _reference(x, indices, size, params):
    """Plain-JAX reference with true scatter-based max_unpool2d (PyTorch semantics)."""
    (w1, b1, g1, be1, rm1, rv1, w2, b2, g2, be2, rm2, rv2) = params
    eps = 1e-5
    N, C, Hp, Wp = x.shape
    Hu, Wu = size[2], size[3]
    flat = jnp.zeros((N, C, Hu * Wu), x.dtype)
    n_ix = jnp.arange(N)[:, None, None, None]
    c_ix = jnp.arange(C)[None, :, None, None]
    flat = flat.at[n_ix, c_ix, indices].set(x)
    unpooled = flat.reshape(N, C, Hu, Wu)

    y = jnp.transpose(unpooled, (0, 2, 3, 1))
    dn = ("NHWC", "HWIO", "NHWC")

    def block(inp, w, b, g, be, rm, rv):
        z = lax.conv_general_dilated(inp, jnp.transpose(w, (2, 3, 1, 0)),
                                     (1, 1), "SAME", dimension_numbers=dn)
        z = z + b
        z = (z - rm) / jnp.sqrt(rv + eps) * g + be
        return jnp.maximum(z, 0.0)

    y = block(y, w1, b1, g1, be1, rm1, rv1)
    y = block(y, w2, b2, g2, be2, rm2, rv2)
    return jnp.transpose(y, (0, 3, 1, 2))


if __name__ == "__main__":
    key = jax.random.PRNGKey(0)
    N, Cin, Cout = 2, 16, 8            # n_in_feat=16, n_out_feat=8
    Hp, Wp = 8, 8                      # pooled spatial size
    Hu, Wu = 2 * Hp, 2 * Wp
    size = (N, Cin, Hu, Wu)            # pre-pool feature-map size, as torch passes it

    ks = jax.random.split(key, 15)
    x = jax.random.normal(ks[0], (N, Cin, Hp, Wp), jnp.float32)

    # indices as produced by F.max_pool2d(..., 2, 2, return_indices=True): each window's
    # flat index (into the Hu x Wu plane) lies inside its own 2x2 window.
    dh = jax.random.randint(ks[1], (N, Cin, Hp, Wp), 0, 2)
    dw = jax.random.randint(ks[2], (N, Cin, Hp, Wp), 0, 2)
    ii = jnp.arange(Hp)[None, None, :, None]
    jj = jnp.arange(Wp)[None, None, None, :]
    indices = ((2 * ii + dh) * Wu + (2 * jj + dw)).astype(jnp.int32)

    w1 = jax.random.normal(ks[3], (Cin, Cin, 3, 3), jnp.float32) * 0.2
    b1 = jax.random.normal(ks[4], (Cin,), jnp.float32) * 0.1
    g1 = 1.0 + 0.1 * jax.random.normal(ks[5], (Cin,), jnp.float32)
    be1 = 0.1 * jax.random.normal(ks[6], (Cin,), jnp.float32)
    rm1 = 0.1 * jax.random.normal(ks[7], (Cin,), jnp.float32)
    rv1 = 0.5 + jnp.abs(jax.random.normal(ks[8], (Cin,), jnp.float32))
    w2 = jax.random.normal(ks[9], (Cout, Cin, 3, 3), jnp.float32) * 0.1
    b2 = jax.random.normal(ks[10], (Cout,), jnp.float32) * 0.1
    g2 = 1.0 + 0.1 * jax.random.normal(ks[11], (Cout,), jnp.float32)
    be2 = 0.1 * jax.random.normal(ks[12], (Cout,), jnp.float32)
    rm2 = 0.1 * jax.random.normal(ks[13], (Cout,), jnp.float32)
    rv2 = 0.5 + jnp.abs(jax.random.normal(ks[14], (Cout,), jnp.float32))
    params = (w1, b1, g1, be1, rm1, rv1, w2, b2, g2, be2, rm2, rv2)

    fwd = jax.jit(decoder_forward, static_argnums=(2,))
    out = jax.block_until_ready(fwd(x, indices, size, params))

    ref = _reference(x, indices, size, params)
    assert out.shape == (N, Cout, Hu, Wu)
    # Kernel matmuls use bf16 operands (f32 accumulation) vs the pure-f32 reference,
    # so the tolerance is loosened accordingly.
    assert jnp.allclose(out, ref, atol=1e-1, rtol=1e-1), float(jnp.max(jnp.abs(out - ref)))
    print("KERNEL_OK")
</pallas_src>

<mosaic_0001>
module attributes {stable_mosaic.version = 11 : i64} {
  func.func @_decoder_kernel(%arg0: i32, %arg1: memref<1x16x64xf32, #tpu.memory_space<vmem>>, %arg2: memref<1x16x64xi8, #tpu.memory_space<vmem>>, %arg3: memref<16x16x1xf32, #tpu.memory_space<vmem>>, %arg4: memref<2x256xbf16, #tpu.memory_space<vmem>>, %arg5: memref<16x144xbf16, #tpu.memory_space<vmem>>, %arg6: memref<16x1xf32, #tpu.memory_space<vmem>>, %arg7: memref<16x1xf32, #tpu.memory_space<vmem>>, %arg8: memref<8x144xbf16, #tpu.memory_space<vmem>>, %arg9: memref<8x1xf32, #tpu.memory_space<vmem>>, %arg10: memref<8x1xf32, #tpu.memory_space<vmem>>, %arg11: memref<1x8x256xf32, #tpu.memory_space<vmem>>) attributes {dimension_semantics = [#tpu.dimension_semantics<parallel>], iteration_bounds = array<i64: 2>, scalar_prefetch = 0 : i64, scratch_operands = 0 : i64, tpu.core_type = #tpu.core_type<tc>, window_params = [{transform_indices = @transform_0, window_bounds = array<i64: 1, 16, 64>}, {transform_indices = @transform_1, window_bounds = array<i64: 1, 16, 64>}, {pipeline_mode = #tpu.pipeline_mode<synchronous>, transform_indices = @transform_2, window_bounds = array<i64: 16, 16, 1>}, {pipeline_mode = #tpu.pipeline_mode<synchronous>, transform_indices = @transform_3, window_bounds = array<i64: 2, 256>}, {pipeline_mode = #tpu.pipeline_mode<synchronous>, transform_indices = @transform_4, window_bounds = array<i64: 16, 144>}, {pipeline_mode = #tpu.pipeline_mode<synchronous>, transform_indices = @transform_5, window_bounds = array<i64: 16, 1>}, {pipeline_mode = #tpu.pipeline_mode<synchronous>, transform_indices = @transform_6, window_bounds = array<i64: 16, 1>}, {pipeline_mode = #tpu.pipeline_mode<synchronous>, transform_indices = @transform_7, window_bounds = array<i64: 8, 144>}, {pipeline_mode = #tpu.pipeline_mode<synchronous>, transform_indices = @transform_8, window_bounds = array<i64: 8, 1>}, {pipeline_mode = #tpu.pipeline_mode<synchronous>, transform_indices = @transform_9, window_bounds = array<i64: 8, 1>}, {transform_indices = @transform_10, window_bounds = array<i64: 1, 8, 256>}]} {
    %cst = arith.constant 0.000000e+00 : bf16
    %0 = vector.broadcast %cst : bf16 to vector<16x128xbf16>
    %c0 = arith.constant 0 : index
    %c0_0 = arith.constant 0 : index
    %1 = vector.load %arg4[%c0, %c0_0] : memref<2x256xbf16, #tpu.memory_space<vmem>>, vector<1x256xbf16>
    %c1 = arith.constant 1 : index
    %c0_1 = arith.constant 0 : index
    %2 = vector.load %arg4[%c1, %c0_1] : memref<2x256xbf16, #tpu.memory_space<vmem>>, vector<1x256xbf16>
    %c0_2 = arith.constant 0 : index
    %c0_3 = arith.constant 0 : index
    %c0_4 = arith.constant 0 : index
    %3 = vector.load %arg3[%c0_2, %c0_3, %c0_4] : memref<16x16x1xf32, #tpu.memory_space<vmem>>, vector<16x16x1xf32>
    %c0_5 = arith.constant 0 : index
    %c0_6 = arith.constant 0 : index
    %c0_7 = arith.constant 0 : index
    %4 = vector.load %arg1[%c0_5, %c0_6, %c0_7] : memref<1x16x64xf32, #tpu.memory_space<vmem>>, vector<1x16x64xf32>
    %5 = vector.shape_cast %4 : vector<1x16x64xf32> to vector<16x64xf32>
    %c0_8 = arith.constant 0 : index
    %c0_9 = arith.constant 0 : index
    %c0_10 = arith.constant 0 : index
    %6 = vector.load %arg2[%c0_8, %c0_9, %c0_10] : memref<1x16x64xi8, #tpu.memory_space<vmem>>, vector<1x16x64xi8>
    %7 = vector.shape_cast %6 : vector<1x16x64xi8> to vector<16x64xi8>
    %8 = arith.extsi %7 : vector<16x64xi8> to vector<16x64xi32>
    %9 = arith.sitofp %8 : vector<16x64xi32> to vector<16x64xf32>
    %10 = tpu.transpose %5, [1, 0] : vector<16x64xf32> -> vector<64x16xf32>
    %11 = vector.shape_cast %10 : vector<64x16xf32> to vector<8x8x16xf32>
    %12 = tpu.transpose %9, [1, 0] : vector<16x64xf32> -> vector<64x16xf32>
    %13 = vector.shape_cast %12 : vector<64x16xf32> to vector<8x8x16xf32>
    %14 = vector.shape_cast %13 : vector<8x8x16xf32> to vector<8x1x8x16xf32>
    %15 = vector.shape_cast %14 : vector<8x1x8x16xf32> to vector<8x1x8x16xf32>
    %16 = vector.broadcast %15 : vector<8x1x8x16xf32> to vector<8x2x8x16xf32>
    %17 = vector.shape_cast %16 : vector<8x2x8x16xf32> to vector<16x8x16xf32>
    %18 = vector.shape_cast %17 : vector<16x8x16xf32> to vector<16x8x1x16xf32>
    %19 = vector.shape_cast %18 : vector<16x8x1x16xf32> to vector<16x8x1x16xf32>
    %20 = vector.broadcast %19 : vector<16x8x1x16xf32> to vector<16x8x2x16xf32>
    %21 = vector.shape_cast %20 : vector<16x8x2x16xf32> to vector<16x16x16xf32>
    %22 = vector.broadcast %3 : vector<16x16x1xf32> to vector<16x16x16xf32>
    %23 = arith.cmpf oeq, %21, %22 : vector<16x16x16xf32>
    %24 = vector.shape_cast %11 : vector<8x8x16xf32> to vector<8x1x8x16xf32>
    %25 = vector.shape_cast %24 : vector<8x1x8x16xf32> to vector<8x1x8x16xf32>
    %26 = vector.broadcast %25 : vector<8x1x8x16xf32> to vector<8x2x8x16xf32>
    %27 = vector.shape_cast %26 : vector<8x2x8x16xf32> to vector<16x8x16xf32>
    %28 = vector.shape_cast %27 : vector<16x8x16xf32> to vector<16x8x1x16xf32>
    %29 = vector.shape_cast %28 : vector<16x8x1x16xf32> to vector<16x8x1x16xf32>
    %30 = vector.broadcast %29 : vector<16x8x1x16xf32> to vector<16x8x2x16xf32>
    %31 = vector.shape_cast %30 : vector<16x8x2x16xf32> to vector<16x16x16xf32>
    %cst_11 = arith.constant 0.000000e+00 : f32
    %32 = vector.broadcast %cst_11 : f32 to vector<16x16x16xf32>
    %33 = arith.select %23, %31, %32 : vector<16x16x16xi1>, vector<16x16x16xf32>
    %34 = vector.shape_cast %33 : vector<16x16x16xf32> to vector<256x16xf32>
    %35 = tpu.transpose %34, [1, 0] : vector<256x16xf32> -> vector<16x256xf32>
    %36 = arith.truncf %35 : vector<16x256xf32> to vector<16x256xbf16>
    %37 = tpu.concatenate %0, %36, %0 in 1 : vector<16x128xbf16>, vector<16x256xbf16>, vector<16x128xbf16> -> vector<16x512xbf16>
    %38 = vector.extract_strided_slice %37 {offsets = [0, 111], sizes = [16, 256], strides = [1, 1]} : vector<16x512xbf16> to vector<16x256xbf16>
    %39 = vector.broadcast %1 : vector<1x256xbf16> to vector<16x256xbf16>
    %40 = arith.mulf %38, %39 : vector<16x256xbf16>
    %41 = vector.extract_strided_slice %37 {offsets = [0, 112], sizes = [16, 256], strides = [1, 1]} : vector<16x512xbf16> to vector<16x256xbf16>
    %42 = vector.extract_strided_slice %37 {offsets = [0, 113], sizes = [16, 256], strides = [1, 1]} : vector<16x512xbf16> to vector<16x256xbf16>
    %43 = vector.broadcast %2 : vector<1x256xbf16> to vector<16x256xbf16>
    %44 = arith.mulf %42, %43 : vector<16x256xbf16>
    %45 = vector.extract_strided_slice %37 {offsets = [0, 127], sizes = [16, 256], strides = [1, 1]} : vector<16x512xbf16> to vector<16x256xbf16>
    %46 = vector.broadcast %1 : vector<1x256xbf16> to vector<16x256xbf16>
    %47 = arith.mulf %45, %46 : vector<16x256xbf16>
    %48 = vector.extract_strided_slice %37 {offsets = [0, 128], sizes = [16, 256], strides = [1, 1]} : vector<16x512xbf16> to vector<16x256xbf16>
    %49 = vector.extract_strided_slice %37 {offsets = [0, 129], sizes = [16, 256], strides = [1, 1]} : vector<16x512xbf16> to vector<16x256xbf16>
    %50 = vector.broadcast %2 : vector<1x256xbf16> to vector<16x256xbf16>
    %51 = arith.mulf %49, %50 : vector<16x256xbf16>
    %52 = vector.extract_strided_slice %37 {offsets = [0, 143], sizes = [16, 256], strides = [1, 1]} : vector<16x512xbf16> to vector<16x256xbf16>
    %53 = vector.broadcast %1 : vector<1x256xbf16> to vector<16x256xbf16>
    %54 = arith.mulf %52, %53 : vector<16x256xbf16>
    %55 = vector.extract_strided_slice %37 {offsets = [0, 144], sizes = [16, 256], strides = [1, 1]} : vector<16x512xbf16> to vector<16x256xbf16>
    %56 = vector.extract_strided_slice %37 {offsets = [0, 145], sizes = [16, 256], strides = [1, 1]} : vector<16x512xbf16> to vector<16x256xbf16>
    %57 = vector.broadcast %2 : vector<1x256xbf16> to vector<16x256xbf16>
    %58 = arith.mulf %56, %57 : vector<16x256xbf16>
    %59 = tpu.concatenate %40, %41, %44, %47, %48, %51, %54, %55, %58 in 0 : vector<16x256xbf16>, vector<16x256xbf16>, vector<16x256xbf16>, vector<16x256xbf16>, vector<16x256xbf16>, vector<16x256xbf16>, vector<16x256xbf16>, vector<16x256xbf16>, vector<16x256xbf16> -> vector<144x256xbf16>
    %c0_12 = arith.constant 0 : index
    %c0_13 = arith.constant 0 : index
    %60 = vector.load %arg5[%c0_12, %c0_13] : memref<16x144xbf16, #tpu.memory_space<vmem>>, vector<16x144xbf16>
    %cst_14 = arith.constant dense<0.000000e+00> : vector<16x256xf32>
    %61 = tpu.matmul %60, %59, %cst_14 {dimension_numbers = #tpu.dot_dimension_numbers<[1], [0], [0], [1], [0, 0, 1, 1], [], []>} : vector<16x144xbf16>, vector<144x256xbf16>, vector<16x256xf32> -> vector<16x256xf32>
    %c0_15 = arith.constant 0 : index
    %c0_16 = arith.constant 0 : index
    %62 = vector.load %arg6[%c0_15, %c0_16] : memref<16x1xf32, #tpu.memory_space<vmem>>, vector<16x1xf32>
    %63 = vector.broadcast %62 : vector<16x1xf32> to vector<16x256xf32>
    %64 = arith.mulf %61, %63 : vector<16x256xf32>
    %c0_17 = arith.constant 0 : index
    %c0_18 = arith.constant 0 : index
    %65 = vector.load %arg7[%c0_17, %c0_18] : memref<16x1xf32, #tpu.memory_space<vmem>>, vector<16x1xf32>
    %66 = vector.broadcast %65 : vector<16x1xf32> to vector<16x256xf32>
    %67 = arith.addf %64, %66 : vector<16x256xf32>
    %cst_19 = arith.constant 0.000000e+00 : f32
    %68 = vector.broadcast %cst_19 : f32 to vector<16x256xf32>
    %69 = arith.maximumf %67, %68 : vector<16x256xf32>
    %70 = arith.truncf %69 : vector<16x256xf32> to vector<16x256xbf16>
    %71 = tpu.concatenate %0, %70, %0 in 1 : vector<16x128xbf16>, vector<16x256xbf16>, vector<16x128xbf16> -> vector<16x512xbf16>
    %72 = vector.extract_strided_slice %71 {offsets = [0, 111], sizes = [16, 256], strides = [1, 1]} : vector<16x512xbf16> to vector<16x256xbf16>
    %73 = vector.broadcast %1 : vector<1x256xbf16> to vector<16x256xbf16>
    %74 = arith.mulf %72, %73 : vector<16x256xbf16>
    %75 = vector.extract_strided_slice %71 {offsets = [0, 112], sizes = [16, 256], strides = [1, 1]} : vector<16x512xbf16> to vector<16x256xbf16>
    %76 = vector.extract_strided_slice %71 {offsets = [0, 113], sizes = [16, 256], strides = [1, 1]} : vector<16x512xbf16> to vector<16x256xbf16>
    %77 = vector.broadcast %2 : vector<1x256xbf16> to vector<16x256xbf16>
    %78 = arith.mulf %76, %77 : vector<16x256xbf16>
    %79 = vector.extract_strided_slice %71 {offsets = [0, 127], sizes = [16, 256], strides = [1, 1]} : vector<16x512xbf16> to vector<16x256xbf16>
    %80 = vector.broadcast %1 : vector<1x256xbf16> to vector<16x256xbf16>
    %81 = arith.mulf %79, %80 : vector<16x256xbf16>
    %82 = vector.extract_strided_slice %71 {offsets = [0, 128], sizes = [16, 256], strides = [1, 1]} : vector<16x512xbf16> to vector<16x256xbf16>
    %83 = vector.extract_strided_slice %71 {offsets = [0, 129], sizes = [16, 256], strides = [1, 1]} : vector<16x512xbf16> to vector<16x256xbf16>
    %84 = vector.broadcast %2 : vector<1x256xbf16> to vector<16x256xbf16>
    %85 = arith.mulf %83, %84 : vector<16x256xbf16>
    %86 = vector.extract_strided_slice %71 {offsets = [0, 143], sizes = [16, 256], strides = [1, 1]} : vector<16x512xbf16> to vector<16x256xbf16>
    %87 = vector.broadcast %1 : vector<1x256xbf16> to vector<16x256xbf16>
    %88 = arith.mulf %86, %87 : vector<16x256xbf16>
    %89 = vector.extract_strided_slice %71 {offsets = [0, 144], sizes = [16, 256], strides = [1, 1]} : vector<16x512xbf16> to vector<16x256xbf16>
    %90 = vector.extract_strided_slice %71 {offsets = [0, 145], sizes = [16, 256], strides = [1, 1]} : vector<16x512xbf16> to vector<16x256xbf16>
    %91 = vector.broadcast %2 : vector<1x256xbf16> to vector<16x256xbf16>
    %92 = arith.mulf %90, %91 : vector<16x256xbf16>
    %93 = tpu.concatenate %74, %75, %78, %81, %82, %85, %88, %89, %92 in 0 : vector<16x256xbf16>, vector<16x256xbf16>, vector<16x256xbf16>, vector<16x256xbf16>, vector<16x256xbf16>, vector<16x256xbf16>, vector<16x256xbf16>, vector<16x256xbf16>, vector<16x256xbf16> -> vector<144x256xbf16>
    %c0_20 = arith.constant 0 : index
    %c0_21 = arith.constant 0 : index
    %94 = vector.load %arg8[%c0_20, %c0_21] : memref<8x144xbf16, #tpu.memory_space<vmem>>, vector<8x144xbf16>
    %cst_22 = arith.constant dense<0.000000e+00> : vector<8x256xf32>
    %95 = tpu.matmul %94, %93, %cst_22 {dimension_numbers = #tpu.dot_dimension_numbers<[1], [0], [0], [1], [0, 0, 1, 1], [], []>} : vector<8x144xbf16>, vector<144x256xbf16>, vector<8x256xf32> -> vector<8x256xf32>
    %c0_23 = arith.constant 0 : index
    %c0_24 = arith.constant 0 : index
    %96 = vector.load %arg9[%c0_23, %c0_24] : memref<8x1xf32, #tpu.memory_space<vmem>>, vector<8x1xf32>
    %97 = vector.broadcast %96 : vector<8x1xf32> to vector<8x256xf32>
    %98 = arith.mulf %95, %97 : vector<8x256xf32>
    %c0_25 = arith.constant 0 : index
    %c0_26 = arith.constant 0 : index
    %99 = vector.load %arg10[%c0_25, %c0_26] : memref<8x1xf32, #tpu.memory_space<vmem>>, vector<8x1xf32>
    %100 = vector.broadcast %99 : vector<8x1xf32> to vector<8x256xf32>
    %101 = arith.addf %98, %100 : vector<8x256xf32>
    %cst_27 = arith.constant 0.000000e+00 : f32
    %102 = vector.broadcast %cst_27 : f32 to vector<8x256xf32>
    %103 = arith.maximumf %101, %102 : vector<8x256xf32>
    %c0_28 = arith.constant 0 : index
    %c0_29 = arith.constant 0 : index
    %c0_30 = arith.constant 0 : index
    %104 = vector.load %arg11[%c0_28, %c0_29, %c0_30] : memref<1x8x256xf32, #tpu.memory_space<vmem>>, vector<1x8x256xf32>
    %105 = vector.shape_cast %104 : vector<1x8x256xf32> to vector<8x256xf32>
    %106 = vector.shape_cast %103 : vector<8x256xf32> to vector<1x8x256xf32>
    tpu.vector_store %arg11[%c0_28, %c0_29, %c0_30], %106 {strides = array<i32>} : memref<1x8x256xf32, #tpu.memory_space<vmem>>, vector<1x8x256xf32>,
    return
  }
  func.func @transform_0(%arg0: i32) -> (i32, i32, i32) {
    %c0_i32 = arith.constant 0 : i32
    %c0_i32_0 = arith.constant 0 : i32
    %c0_i32_1 = arith.constant 0 : i32
    return %arg0, %c0_i32, %c0_i32_0 : i32, i32, i32
  }
  func.func @transform_1(%arg0: i32) -> (i32, i32, i32) {
    %c0_i32 = arith.constant 0 : i32
    %c0_i32_0 = arith.constant 0 : i32
    %c0_i32_1 = arith.constant 0 : i32
    return %arg0, %c0_i32, %c0_i32_0 : i32, i32, i32
  }
  func.func @transform_2(%arg0: i32) -> (i32, i32, i32) {
    %c0_i32 = arith.constant 0 : i32
    %c0_i32_0 = arith.constant 0 : i32
    %c0_i32_1 = arith.constant 0 : i32
    %c0_i32_2 = arith.constant 0 : i32
    return %c0_i32, %c0_i32_0, %c0_i32_1 : i32, i32, i32
  }
  func.func @transform_3(%arg0: i32) -> (i32, i32) {
    %c0_i32 = arith.constant 0 : i32
    %c0_i32_0 = arith.constant 0 : i32
    %c0_i32_1 = arith.constant 0 : i32
    return %c0_i32, %c0_i32_0 : i32, i32
  }
  func.func @transform_4(%arg0: i32) -> (i32, i32) {
    %c0_i32 = arith.constant 0 : i32
    %c0_i32_0 = arith.constant 0 : i32
    %c0_i32_1 = arith.constant 0 : i32
    return %c0_i32, %c0_i32_0 : i32, i32
  }
  func.func @transform_5(%arg0: i32) -> (i32, i32) {
    %c0_i32 = arith.constant 0 : i32
    %c0_i32_0 = arith.constant 0 : i32
    %c0_i32_1 = arith.constant 0 : i32
    return %c0_i32, %c0_i32_0 : i32, i32
  }
  func.func @transform_6(%arg0: i32) -> (i32, i32) {
    %c0_i32 = arith.constant 0 : i32
    %c0_i32_0 = arith.constant 0 : i32
    %c0_i32_1 = arith.constant 0 : i32
    return %c0_i32, %c0_i32_0 : i32, i32
  }
  func.func @transform_7(%arg0: i32) -> (i32, i32) {
    %c0_i32 = arith.constant 0 : i32
    %c0_i32_0 = arith.constant 0 : i32
    %c0_i32_1 = arith.constant 0 : i32
    return %c0_i32, %c0_i32_0 : i32, i32
  }
  func.func @transform_8(%arg0: i32) -> (i32, i32) {
    %c0_i32 = arith.constant 0 : i32
    %c0_i32_0 = arith.constant 0 : i32
    %c0_i32_1 = arith.constant 0 : i32
    return %c0_i32, %c0_i32_0 : i32, i32
  }
  func.func @transform_9(%arg0: i32) -> (i32, i32) {
    %c0_i32 = arith.constant 0 : i32
    %c0_i32_0 = arith.constant 0 : i32
    %c0_i32_1 = arith.constant 0 : i32
    return %c0_i32, %c0_i32_0 : i32, i32
  }
  func.func @transform_10(%arg0: i32) -> (i32, i32, i32) {
    %c0_i32 = arith.constant 0 : i32
    %c0_i32_0 = arith.constant 0 : i32
    %c0_i32_1 = arith.constant 0 : i32
    return %arg0, %c0_i32, %c0_i32_0 : i32, i32, i32
  }
}

</mosaic_0001>

<bundles_post_ra>
// kernel: decoder_forward.1
= control target key start
LH: loop header
LB: loop body
LE: loop exit
PB: predicated region body
PF: predicated region fallthrough
CT: control target
= control target key end

     0   :  { %s4990_s13 = smov 0   ;;  %s7651_s0 = inlined_call_operand.vmem [shape: f32[2,16,64], index: 0, kind: input, shape index: {}]   ;;  %s7652_s1 = inlined_call_operand.vmem [shape: s8[2,16,64], index: 1, kind: input, shape index: {}]   ;;  %s7653_s2 = inlined_call_operand.vmem [shape: f32[16,16,1], index: 2, kind: input, shape index: {}]   ;;  %s7654_s3 = inlined_call_operand.vmem [shape: bf16[2,256], index: 3, kind: input, shape index: {}]   ;;  %s7655_s4 = inlined_call_operand.vmem [shape: bf16[16,144], index: 4, kind: input, shape index: {}]   ;;  %s7656_s5 = inlined_call_operand.vmem [shape: f32[16,1], index: 5, kind: input, shape index: {}]   ;;  %s7657_s6 = inlined_call_operand.vmem [shape: f32[16,1], index: 6, kind: input, shape index: {}]   ;;  %s7658_s7 = inlined_call_operand.vmem [shape: bf16[8,144], index: 7, kind: input, shape index: {}]   ;;  %s7659_s8 = inlined_call_operand.vmem [shape: f32[8,1], index: 8, kind: input, shape index: {}]   ;;  %s7660_s9 = inlined_call_operand.vmem [shape: f32[8,1], index: 9, kind: input, shape index: {}]   ;;  %s7661_s10 = inlined_call_operand.vmem [shape: f32[2,8,256], index: 10, kind: output, shape index: {}]  }
   0x1 LB: > { %s4804_s14 = sadd.s32 4294967295, %s4914_s13   ;;  %p4808_p0 = scmp.ge.s32.totalorder %s4914_s13, 1  ;;  %s4914_s13 = sphi %s4990_s13, %s20_s13  }
   0x2   : > { %p322_p1 = scmp.lt.s32.totalorder %s4914_s13, 3 }
   0x4   : > { %p323_p2 = pnand %p4808_p0, %p322_p1 }
   0x6   : > { %326 = sbr.rel (%p323_p2) target bundleno = 1488 (0x5d0), region = 60 }
   0xb   : > { %p365_p3 = scmp.lt.s32.totalorder %s4804_s14, 1  ;;  %v7662_v7 = vmov 0   ;;  %v383_v8 = vld [vmem:[%s7653_s2 + $0x8] sm:$0xff]  ;;  %v400_v10 = vld [vmem:[%s7653_s2 + $0x90] sm:$0xff]  ;;  %v401_v11 = vld [vmem:[%s7653_s2 + $0x98] sm:$0xff]  ;;  %v498_v28 = vlaneseq  ;;  %s4918_s12 = smov 15  }
   0xc   : > { %v399_v9 = vld [vmem:[%s7653_s2 + $0x88] sm:$0xff]  ;;  %v382_v12 = vld [vmem:[%s7653_s2] sm:$0xff]  ;;  %v384_v16 = vld [vmem:[%s7653_s2 + $0x10] sm:$0xff]  ;;  %v4917_v26 = vmov 1966171168   ;;  %s4920_s18 = smov 1  }
   0xd   : > { %s8322_s14 = smov (!%p365_p3, %s4804_s14), 1  ;;  %v402_v13 = vld [vmem:[%s7653_s2 + $0xa0] sm:$0xff]  ;;  %v403_v15 = vld [vmem:[%s7653_s2 + $0xa8] sm:$0xff]  ;;  %v404_v17 = vld [vmem:[%s7653_s2 + $0xb0] sm:$0xff]  ;;  %v496_v27 = vunpack.c.l.s4 %v4917_v26  ;;  %v5072_v32 = vshrl.u32 %v498_v28, 7  ;;  %s4925_s23 = smov 127  }
   0xe   : > { %s4824_s15 = sshll.u32 %s8322_s14, 4  ;;  %s4825_s16 = sshll.u32 %s8322_s14, 2  ;;  %v398_v14 = vld [vmem:[%s7653_s2 + $0x80] sm:$0xff]  ;;  %v385_v18 = vld [vmem:[%s7653_s2 + $0x18] sm:$0xff]  ;;  %v387_v22 = vld [vmem:[%s7653_s2 + $0x28] sm:$0xff] }
   0xf   : > { %s369_s19 = scalar_lea.vmem %s7651_s0, %s4824_s15  ;;  %s374_s22 = scalar_lea.vmem %s7652_s1, %s4825_s16  ;;  %v389_v19 = vld [vmem:[%s7653_s2 + $0x38] sm:$0xff]  ;;  %v386_v20 = vld [vmem:[%s7653_s2 + $0x20] sm:$0xff]  ;;  %v388_v24 = vld [vmem:[%s7653_s2 + $0x30] sm:$0xff]  ;;  %v497_v31 = vunpack.c.0.s8 %v496_v27  ;;  %v5100_v43 = vsub.s32 0, %v5072_v32  ;;  %v4919_v58 = vmov 269488144  }
  0x10   : > { %v414_v0 = vld [vmem:[%s369_s19] sm:$0xff]  ;;  %v415_v3 = vld [vmem:[%s369_s19 + $0x8] sm:$0xff]  ;;  %v405_v21 = vld [vmem:[%s7653_s2 + $0xb8] sm:$0xff]  ;;  %v1335_v59 = vunpack.c.l.s4 %v4919_v58  ;;  %v4921_v60 = vmov 842150450   ;;  %s4926_s24 = smov 113  }
  0x11   : > { %422 = vxpose.xlu1.b32.start [1/2] (short) (narrow) %v414_v0, 64  ;;  %v4828_v1 = vld [vmem:[%s374_s22] sm:$0xf]   ;;  %v408_v25 = vld [vmem:[%s7653_s2 + $0xd0] sm:$0xff]  ;;  %v409_v30 = vld [vmem:[%s7653_s2 + $0xd8] sm:$0xff]  ;;  %v5084_v36 = vsub.s32 %v497_v31, %v5072_v32  ;;  %v1342_v61 = vunpack.c.l.s4 %v4921_v60  ;;  %s4927_s25 = smov 17  }
  0x12   : > { %v4829_v2 = vunpack.c.0.s8 %v4828_v1  ;;  %v4830_v4 = vunpack.c.1.s8 %v4828_v1  ;;  %v406_v23 = vld [vmem:[%s7653_s2 + $0xc0] sm:$0xff]  ;;  %v391_v33 = vld [vmem:[%s7653_s2 + $0x48] sm:$0xff]  ;;  %v392_v41 = vld [vmem:[%s7653_s2 + $0x50] sm:$0xff]  ;;  %v4922_v63 = vmov 1414812756   ;;  %s4928_s26 = smov 95  }
  0x13   : > { %v390_v29 = vld [vmem:[%s7653_s2 + $0x40] sm:$0xff]  ;;  %v407_v38 = vld [vmem:[%s7653_s2 + $0xc8] sm:$0xff]  ;;  %v412_v42 = vld [vmem:[%s7653_s2 + $0xf0] sm:$0xff]  ;;  %v1349_v0 = vunpack.c.l.s4 %v4922_v63  ;;  %v4923_v1 = vmov 1987475062   ;;  %s4929_s27 = smov 96  }
  0x14   : > { %v420_v5 = vcvt.s32.f32 %v4829_v2  ;;  %v421_v6 = vcvt.s32.f32 %v4830_v4  ;;  %v410_v34 = vld [vmem:[%s7653_s2 + $0xe0] sm:$0xff]  ;;  %v411_v39 = vld [vmem:[%s7653_s2 + $0xe8] sm:$0xff]  ;;  %v393_v46 = vld [vmem:[%s7653_s2 + $0x58] sm:$0xff]  ;;  %v1356_v2 = vunpack.c.l.s4 %v4923_v1  ;;  %s4930_s28 = smov 110   ;;  %s4931_s29 = smov 112  }
  0x15   : > { %423 = vxpose.xlu1.b32.end [2/2] (short) (narrow) %v415_v3, 64  ;;  %v4815_v35 = vld.sshfl [vmem:[%s7654_s3] sm:$0x11 pattern:$0x75316420]  ;;  %v413_v47 = vld [vmem:[%s7653_s2 + $0xf8] sm:$0xff] }
  0x16   : > { %454 = vxpose.xlu0.b32.start [1/2] (short) (narrow) %v420_v5, 64  ;;  %v4112_v37 = vcombine.high %v4815_v35, %v4815_v35  ;;  %v394_v50 = vld [vmem:[%s7653_s2 + $0x60] sm:$0xff]  ;;  %v395_v52 = vld [vmem:[%s7653_s2 + $0x68] sm:$0xff]  ;;  %v4119_v53 = vrot.slane %v4815_v35, %v5084_v36  ;;  %v396_v62 = vld [vmem:[%s7653_s2 + $0x70] sm:$0xff]  ;;  %s4932_s30 = smov 126   ;;  %s4933_s11 = smov 111  }
  0x18   : > { %v4126_v40 = vrot.slane %v4112_v37, %v5084_v36  ;;  %v4155_v57 = vshrl.u32 %v4119_v53, 16 }
  0x1a   : > { %455 = vxpose.xlu0.b32.end [2/2] (short) (narrow) %v421_v6, 64  ;;  %v4135_v44 = vpack.i.b16 %v4126_v40, %v4126_v40  ;;  %v4162_v45 = vshrl.u32 %v4126_v40, 16  ;;  %v4128_v6 = vpack.i.b16 %v4119_v53, %v4119_v53 }
  0x1c   : > { %v5109_v48 = vrot.slane %v4135_v44, %v5100_v43  ;;  %v4163_v49 = vpack.i.b16 %v4162_v45, %v4162_v45 }
  0x1e   : > { %7791 = vst [vmem:[#allocation2_spill] sm:$0xff] %v5109_v48  ;;  %v5117_v51 = vrot.slane %v4163_v49, %v5100_v43 }
  0x33   : > { %4860 = vset.pattern.permute.xlu1 %v7662_v7 }
  0x43   : > { %4859 = vset.pattern.permute.xlu0 %v7662_v7 }
  0x4b   : > { %1212 = vperm.xlu1 %4860, %v383_v8   ;;  %v4156_v8 = vpack.i.b16 %v4155_v57, %v4155_v57 }
  0x4f   : > { %1276 = vperm.xlu1 %4860, %v399_v9   ;;  %v1336_v9 = vunpack.c.0.s8 %v1335_v59 }
  0x51   : > { %v5147_v27 = vsub.s32 %v1336_v9, %v5072_v32 }
  0x53   : > { %1280 = vperm.xlu1 %4860, %v400_v10  }
  0x57   : > { %1284 = vperm.xlu1 %4860, %v401_v11  }
  0x5b   : > { %1208 = vperm.xlu0 %4859, %v382_v12   ;;  %1288 = vperm.xlu1 %4860, %v402_v13   ;;  %v1343_v12 = vunpack.c.0.s8 %v1342_v61  ;;  %v4924_v13 = vmov 1983009808  }
  0x5d   : > { %v5150_v28 = vsub.s32 %v1343_v12, %v5072_v32 }
  0x5f   : > { %1272 = vperm.xlu0 %4859, %v398_v14   ;;  %1292 = vperm.xlu1 %4860, %v403_v15   ;;  %v3465_v14 = vunpack.c.l.s4 %v4924_v13  ;;  %v397_v15 = vld [vmem:[%s7653_s2 + $0x78] sm:$0xff] }
  0x63   : > { %1216 = vperm.xlu0 %4859, %v384_v16   ;;  %1296 = vperm.xlu1 %4860, %v404_v17   ;;  %v1350_v17 = vunpack.c.0.s8 %v1349_v0 }
  0x67   : > { %1220 = vperm.xlu0 %4859, %v385_v18   ;;  %1236 = vperm.xlu1 %4860, %v389_v19   ;;  %v1357_v18 = vunpack.c.0.s8 %v1356_v2 }
  0x6b   : > { %1224 = vperm.xlu0 %4859, %v386_v20   ;;  %1300 = vperm.xlu1 %4860, %v405_v21  }
  0x6f   : > { %1228 = vperm.xlu0 %4859, %v387_v22   ;;  %1304 = vperm.xlu1 %4860, %v406_v23   ;;  %v5140_v23 = vrot.slane %v4128_v6, %v5100_v43 }
  0x71   : > { %7792 = vst [vmem:[#allocation3_spill] sm:$0xff] %v5140_v23 }
  0x73   : > { %1232 = vperm.xlu0 %4859, %v388_v24   ;;  %1312 = vperm.xlu1 %4860, %v408_v25   ;;  %v5143_v24 = vrot.slane %v4156_v8, %v5100_v43 }
  0x77   : > { %1240 = vperm.xlu0 %4859, %v390_v29   ;;  %1316 = vperm.xlu1 %4860, %v409_v30   ;;  %v3466_v29 = vunpack.c.0.s8 %v3465_v14 }
  0x7b   : > { %1244 = vperm.xlu0 %4859, %v391_v33   ;;  %1320 = vperm.xlu1 %4860, %v410_v34   ;;  %v5153_v33 = vsub.s32 %v1350_v17, %v5072_v32  ;;  %v5156_v34 = vsub.s32 %v1357_v18, %v5072_v32 }
  0x7f   : > { %1308 = vperm.xlu0 %4859, %v407_v38   ;;  %1324 = vperm.xlu1 %4860, %v411_v39  }
  0x83   : > { %1248 = vperm.xlu0 %4859, %v392_v41   ;;  %1328 = vperm.xlu1 %4860, %v412_v42  }
  0x87   : > { %1252 = vperm.xlu0 %4859, %v393_v46   ;;  %1332 = vperm.xlu1 %4860, %v413_v47  }
  0x8b   : > { %1256 = vperm.xlu0 %4859, %v394_v50   ;;  %4209 = vrot.lane.b32.xlu1 %v5109_v48, %s4918_s12  ;;  %v5174_v50 = vsub.s32 %v3466_v29, %v5072_v32 }
  0x8d   : > { %v438_v54 = vpop.trf.xlu1 }
  0x8e   : > { %v2494_v55 = vcombine.high %v438_v54, %v438_v54  ;;  %v2501_v56 = vrot.slane %v438_v54, %v5084_v36 }
  0x8f   : > { %1260 = vperm.xlu0 %4859, %v395_v52   ;;  %4197 = vrot.lane.b32.xlu1 %v5117_v51, %s4920_s18 }
  0x90   : > { %v2508_v3 = vrot.slane %v2494_v55, %v5084_v36  ;;  %v2509_v5 = vcombine.high %v2501_v56, %v2501_v56  ;;  %v2517_v16 = vrot.slane %v2501_v56, %v5084_v36 }
  0x91   : > { %v439_v4 = vpop.trf.xlu1 }
  0x92   : > { %v2543_v10 = vcombine.high %v439_v4, %v439_v4  ;;  %v2550_v11 = vrot.slane %v439_v4, %v5084_v36  ;;  %v2510_v19 = vcombine.high %v2508_v3, %v2508_v3  ;;  %v2531_v22 = vrot.slane %v2509_v5, %v5084_v36  ;;  %v470_v40 = vpop.trf.xlu0 }
  0x93   : > { %1264 = vperm.xlu0 %4859, %v396_v62   ;;  %4185 = vrot.lane.b32.xlu1 %v5109_v48, %s4925_s23  ;;  %v2524_v25 = vrot.slane %v2508_v3, %v5084_v36  ;;  %v2539_v30 = vcombine.high %v2517_v16, %v2517_v16  ;;  %v494_v45 = vcombine.high %v470_v40, %v470_v40 }
  0x94   : > { %v2557_v20 = vrot.slane %v2543_v10, %v5084_v36  ;;  %v2558_v21 = vcombine.high %v2550_v11, %v2550_v11  ;;  %v5161_v35 = vrot.slane %v2510_v19, %v5084_v36  ;;  %v2566_v38 = vrot.slane %v2550_v11, %v5084_v36 }
  0x95   : > { %v440_v26 = vpop.trf.xlu1  ;;  %v2541_v41 = vcombine.high %v2531_v22, %v2531_v22  ;;  %v2540_v46 = vcombine.high %v2524_v25, %v2524_v25  ;;  %v5168_v47 = vrot.slane %v2517_v16, %v5100_v43  ;;  %v5177_v52 = vrot.slane %v2531_v22, %v5100_v43 }
  0x96   : > { %v2592_v31 = vcombine.high %v440_v26, %v440_v26  ;;  %v2559_v37 = vcombine.high %v2557_v20, %v2557_v20  ;;  %v2580_v39 = vrot.slane %v2558_v21, %v5084_v36  ;;  %v2599_v42 = vrot.slane %v440_v26, %v5084_v36  ;;  %v471_v21 = vpop.trf.xlu0 }
  0x97   : > { %1268 = vperm.xlu0 %4859, %v397_v15   ;;  %4173 = vrot.lane.b32.xlu1 %v5117_v51, %s4926_s24  ;;  %v2573_v49 = vrot.slane %v2557_v20, %v5084_v36  ;;  %v5180_v53 = vrot.slane %v2539_v30, %v5100_v43  ;;  %v5183_v54 = vrot.slane %v2524_v25, %v5100_v43 }
  0x98   : > { %v2606_v44 = vrot.slane %v2592_v31, %v5084_v36  ;;  %v501_v55 = vrot.slane %v470_v40, %v5084_v36  ;;  %v5189_v57 = vrot.slane %v2559_v37, %v5084_v36  ;;  %v2588_v58 = vcombine.high %v2566_v38, %v2566_v38 }
  0x99   : > { %7793 = vst [vmem:[#allocation4_spill] sm:$0xff] %v5183_v54  ;;  %v2590_v32 = vcombine.high %v2580_v39, %v2580_v39  ;;  %v5192_v59 = vrot.slane %v2541_v41, %v5100_v43  ;;  %v2607_v60 = vcombine.high %v2599_v42, %v2599_v42  ;;  %v508_v62 = vrot.slane %v494_v45, %v5084_v36  ;;  %v441_v12 = vpop.trf.xlu1 }
  0x9a   : > { %7794 = vst [vmem:[#allocation5_spill] sm:$0xff] %v5189_v57  ;;  %v2608_v61 = vcombine.high %v2606_v44, %v2606_v44  ;;  %v5197_v63 = vrot.slane %v5161_v35, %v5100_v43  ;;  %v5200_v0 = vrot.slane %v2540_v46, %v5100_v43  ;;  %v2589_v1 = vcombine.high %v2573_v49, %v2573_v49  ;;  %v472_v31 = vpop.trf.xlu0 }
  0x9b   : > { %4207 = vrot.lane.b32.xlu0 %v5140_v23, %s4918_s12  ;;  %v2615_v2 = vrot.slane %v2599_v42, %v5084_v36  ;;  %v5206_v3 = vrot.slane %v2566_v38, %v5100_v43  ;;  %v5209_v4 = vrot.slane %v2580_v39, %v5100_v43  ;;  %v5212_v5 = vrot.slane %v2573_v49, %v5100_v43  ;;  %s4934_s12 = smov 94  }
  0x9c   : > { %7795 = vst [vmem:[#allocation6_spill] sm:$0xff] %v5197_v63  ;;  %7796 = vst [vmem:[#allocation7_spill] sm:$0xff] %v5200_v0  ;;  %v509_v6 = vcombine.high %v501_v55, %v501_v55  ;;  %v5217_v9 = vrot.slane %v2588_v58, %v5100_v43  ;;  %v5220_v10 = vrot.slane %v2590_v32, %v5100_v43  ;;  %4219 = vrot.lane.b32.xlu1 %v5143_v24, %s4927_s25 }
  0x9d   : > { %7797 = vst [vmem:[#allocation8_spill] sm:$0xff] %v5206_v3  ;;  %7798 = vst [vmem:[#allocation9_spill] sm:$0xff] %v5209_v4  ;;  %v5223_v11 = vrot.slane %v2606_v44, %v5084_v36  ;;  %v5226_v13 = vrot.slane %v2607_v60, %v5084_v36  ;;  %v5229_v14 = vrot.slane %v2608_v61, %v5084_v36  ;;  %v442_v61 = vpop.trf.xlu1 }
  0x9e   : > { %7799 = vst [vmem:[#allocation10_spill] sm:$0xff] %v5212_v5  ;;  %7800 = vst [vmem:[#allocation11_spill] sm:$0xff] %v5217_v9  ;;  %v510_v15 = vcombine.high %v508_v62, %v508_v62  ;;  %v2641_v16 = vcombine.high %v441_v12, %v441_v12  ;;  %v5233_v17 = vrot.slane %v5189_v57, %v5100_v43 }
  0x9f   : > { %4195 = vrot.lane.b32.xlu0 %v5143_v24, %s4920_s18  ;;  %7801 = vst [vmem:[#allocation12_spill] sm:$0xff] %v5220_v10  ;;  %7802 = vst [vmem:[#allocation13_spill] sm:$0xff] %v5223_v11  ;;  %v2637_v18 = vcombine.high %v2615_v2, %v2615_v2  ;;  %v517_v19 = vrot.slane %v501_v55, %v5084_v36  ;;  %v524_v20 = vrot.slane %v508_v62, %v5084_v36 }
  0xa0   : > { %7803 = vst [vmem:[#allocation14_spill] sm:$0xff] %v5226_v13  ;;  %7804 = vst [vmem:[#allocation15_spill] sm:$0xff] %v5229_v14  ;;  %v531_v22 = vrot.slane %v509_v6, %v5084_v36  ;;  %v2648_v25 = vrot.slane %v441_v12, %v5084_v36  ;;  %v2655_v26 = vrot.slane %v2641_v16, %v5084_v36  ;;  %4221 = vrot.lane.b32.xlu1 %v5117_v51, %s4927_s25  ;;  %v473_v51 = vpop.trf.xlu0 }
  0xa1   : > { %7805 = vst [vmem:[#allocation16_spill] sm:$0xff] %v5233_v17  ;;  %v543_v29 = vcombine.high %v471_v21, %v471_v21  ;;  %v5243_v30 = vrot.slane %v2589_v1, %v5100_v43  ;;  %v5248_v37 = vrot.slane %v2615_v2, %v5100_v43  ;;  %v5252_v38 = vrot.slane %v5223_v11, %v5100_v43 }
  0xa2   : > { %v5259_v41 = vrot.slane %v510_v15, %v5084_v36  ;;  %v550_v42 = vrot.slane %v471_v21, %v5084_v36  ;;  %v5264_v44 = vrot.slane %v5226_v13, %v5100_v43  ;;  %v539_v45 = vcombine.high %v517_v19, %v517_v19 }
  0xa3   : > { %4183 = vrot.lane.b32.xlu0 %v5140_v23, %s4925_s23  ;;  %7806 = vst [vmem:[#allocation17_spill] sm:$0xff] %v5243_v30  ;;  %7807 = vst [vmem:[#allocation18_spill] sm:$0xff] %v5248_v37  ;;  %v2656_v46 = vcombine.high %v2648_v25, %v2648_v25  ;;  %v557_v49 = vrot.slane %v543_v29, %v5084_v36  ;;  %v5270_v55 = vrot.slane %v2637_v18, %v5100_v43 }
  0xa4   : > { %7808 = vst [vmem:[#allocation19_spill] sm:$0xff] %v5252_v38  ;;  %7809 = vst [vmem:[#allocation20_spill] sm:$0xff] %v5264_v44  ;;  %v540_v58 = vcombine.high %v524_v20, %v524_v20  ;;  %v541_v32 = vcombine.high %v531_v22, %v531_v22  ;;  %v2657_v60 = vcombine.high %v2655_v26, %v2655_v26  ;;  %v474_v4 = vpop.trf.xlu0 }
  0xa5   : > { %7810 = vst [vmem:[#allocation21_spill] sm:$0xff] %v5270_v55  ;;  %v5273_v62 = vrot.slane %v517_v19, %v5100_v43  ;;  %v5276_v1 = vrot.slane %v531_v22, %v5100_v43  ;;  %v2664_v2 = vrot.slane %v2648_v25, %v5084_v36  ;;  %v2690_v6 = vcombine.high %v442_v61, %v442_v61 }
  0xa6   : > { %v5282_v15 = vrot.slane %v524_v20, %v5100_v43  ;;  %v5285_v16 = vrot.slane %v2655_v26, %v5084_v36  ;;  %v558_v18 = vcombine.high %v550_v42, %v550_v42  ;;  %v5288_v21 = vrot.slane %v539_v45, %v5100_v43 }
  0xa7   : > { %4171 = vrot.lane.b32.xlu0 %v5143_v24, %s4926_s24  ;;  %v5291_v19 = vrot.slane %v2656_v46, %v5084_v36  ;;  %v559_v22 = vcombine.high %v557_v49, %v557_v49  ;;  %v2697_v25 = vrot.slane %v442_v61, %v5084_v36  ;;  %v5295_v29 = vrot.slane %v541_v32, %v5100_v43 }
  0xa8   : > { %7811 = vst [vmem:[#allocation22_spill] sm:$0xff] %v5282_v15  ;;  %7812 = vst [vmem:[#allocation23_spill] sm:$0xff] %v5285_v16  ;;  %v5299_v20 = vrot.slane %v5259_v41, %v5100_v43  ;;  %v5302_v26 = vrot.slane %v2657_v60, %v5084_v36  ;;  %v566_v39 = vrot.slane %v550_v42, %v5084_v36 }
  0xa9   : > { %7813 = vst [vmem:[#allocation24_spill] sm:$0xff] %v5291_v19  ;;  %v5306_v45 = vrot.slane %v540_v58, %v5100_v43  ;;  %v2686_v46 = vcombine.high %v2664_v2, %v2664_v2  ;;  %v573_v40 = vrot.slane %v557_v49, %v5084_v36  ;;  %v2704_v61 = vrot.slane %v2690_v6, %v5084_v36 }
  0xaa   : > { %7814 = vst [vmem:[#allocation25_spill] sm:$0xff] %v5299_v20  ;;  %7815 = vst [vmem:[#allocation26_spill] sm:$0xff] %v5302_v26  ;;  %v5313_v8 = vrot.slane %v2664_v2, %v5100_v43  ;;  %v580_v60 = vrot.slane %v558_v18, %v5084_v36  ;;  %v592_v7 = vcombine.high %v472_v31, %v472_v31 }
  0xab   : > { %7816 = vst [vmem:[#allocation27_spill] sm:$0xff] %v5306_v45  ;;  %v5320_v58 = vrot.slane %v5285_v16, %v5100_v43  ;;  %v5323_v49 = vrot.slane %v559_v22, %v5084_v36  ;;  %v2705_v6 = vcombine.high %v2697_v25, %v2697_v25  ;;  %v5329_v2 = vrot.slane %v5291_v19, %v5100_v43  ;;  %v443_v16 = vpop.trf.xlu1 }
  0xac   : > { %7817 = vst [vmem:[#allocation28_spill] sm:$0xff] %v5313_v8  ;;  %v588_v18 = vcombine.high %v566_v39, %v566_v39  ;;  %v599_v56 = vrot.slane %v472_v31, %v5084_v36  ;;  %v5335_v42 = vrot.slane %v2686_v46, %v5100_v43  ;;  %v589_v22 = vcombine.high %v573_v40, %v573_v40 }
  0xad   : > { %7818 = vst [vmem:[#allocation29_spill] sm:$0xff] %v5320_v58  ;;  %7819 = vst [vmem:[#allocation30_spill] sm:$0xff] %v5323_v49  ;;  %v2706_v12 = vcombine.high %v2704_v61, %v2704_v61  ;;  %v2713_v48 = vrot.slane %v2697_v25, %v5084_v36  ;;  %v590_v23 = vcombine.high %v580_v60, %v580_v60 }
  0xae   : > { %7820 = vst [vmem:[#allocation31_spill] sm:$0xff] %v5329_v2  ;;  %7821 = vst [vmem:[#allocation32_spill] sm:$0xff] %v5335_v42  ;;  %v5339_v32 = vrot.slane %v566_v39, %v5100_v43  ;;  %v5342_v58 = vrot.slane %v573_v40, %v5100_v43  ;;  %v2720_v31 = vrot.slane %v2704_v61, %v5084_v36 }
  0xaf   : > { %v2727_v46 = vrot.slane %v2705_v6, %v5084_v36  ;;  %v606_v26 = vrot.slane %v592_v7, %v5084_v36  ;;  %v2739_v42 = vcombine.high %v443_v16, %v443_v16  ;;  %v5350_v25 = vrot.slane %v580_v60, %v5100_v43 }
  0xb0   : > { %7822 = vst [vmem:[#allocation33_spill] sm:$0xff] %v5339_v32  ;;  %7823 = vst [vmem:[#allocation34_spill] sm:$0xff] %v5342_v58  ;;  %v5353_v39 = vrot.slane %v588_v18, %v5100_v43  ;;  %v607_v2 = vcombine.high %v599_v56, %v599_v56  ;;  %v2746_v40 = vrot.slane %v443_v16, %v5084_v36 }
  0xb1   : > { %7824 = vst [vmem:[#allocation35_spill] sm:$0xff] %v5350_v25  ;;  %v5360_v61 = vrot.slane %v5323_v49, %v5100_v43  ;;  %v5363_v6 = vrot.slane %v589_v22, %v5100_v43  ;;  %v5366_v7 = vrot.slane %v2706_v12, %v5084_v36  ;;  %v2735_v60 = vcombine.high %v2713_v48, %v2713_v48 }
  0xb2   : > { %7825 = vst [vmem:[#allocation36_spill] sm:$0xff] %v5353_v39  ;;  %v5369_v18 = vrot.slane %v590_v23, %v5100_v43  ;;  %v2736_v24 = vcombine.high %v2720_v31, %v2720_v31  ;;  %v615_v16 = vrot.slane %v599_v56, %v5084_v36  ;;  %v2753_v8 = vrot.slane %v2739_v42, %v5084_v36 }
  0xb3   : > { %7826 = vst [vmem:[#allocation37_spill] sm:$0xff] %v5360_v61  ;;  %7827 = vst [vmem:[#allocation38_spill] sm:$0xff] %v5363_v6  ;;  %v2737_v19 = vcombine.high %v2727_v46, %v2727_v46  ;;  %v5374_v13 = vrot.slane %v2713_v48, %v5100_v43  ;;  %v5377_v22 = vrot.slane %v2720_v31, %v5100_v43 }
  0xb4   : > { %7828 = vst [vmem:[#allocation39_spill] sm:$0xff] %v5369_v18  ;;  %v608_v55 = vcombine.high %v606_v26, %v606_v26  ;;  %v5380_v12 = vrot.slane %v606_v26, %v5084_v36  ;;  %v5383_v23 = vrot.slane %v607_v2, %v5084_v36  ;;  %v2754_v44 = vcombine.high %v2746_v40, %v2746_v40 }
  0xb5   : > { %7829 = vst [vmem:[#allocation40_spill] sm:$0xff] %v5374_v13  ;;  %v641_v38 = vcombine.high %v473_v51, %v473_v51  ;;  %v5388_v42 = vrot.slane %v2727_v46, %v5100_v43  ;;  %v5391_v48 = vrot.slane %v2735_v60, %v5100_v43  ;;  %v5395_v31 = vrot.slane %v5366_v7, %v5100_v43 }
  0xb6   : > { %7830 = vst [vmem:[#allocation41_spill] sm:$0xff] %v5380_v12  ;;  %7831 = vst [vmem:[#allocation42_spill] sm:$0xff] %v5383_v23  ;;  %v5398_v26 = vrot.slane %v2736_v24, %v5100_v43  ;;  %v637_v2 = vcombine.high %v615_v16, %v615_v16  ;;  %v2755_v37 = vcombine.high %v2753_v8, %v2753_v8 }
  0xb7   : > { %7832 = vst [vmem:[#allocation43_spill] sm:$0xff] %v5388_v42  ;;  %7833 = vst [vmem:[#allocation44_spill] sm:$0xff] %v5391_v48  ;;  %v648_v11 = vrot.slane %v473_v51, %v5084_v36  ;;  %v5402_v14 = vrot.slane %v2737_v19, %v5100_v43  ;;  %v5405_v46 = vrot.slane %v608_v55, %v5084_v36  ;;  %v444_v19 = vpop.trf.xlu1 }
  0xb8   : > { %v5408_v60 = vrot.slane %v615_v16, %v5100_v43  ;;  %v2762_v56 = vrot.slane %v2746_v40, %v5084_v36  ;;  %v2776_v9 = vrot.slane %v2754_v44, %v5084_v36  ;;  %v655_v51 = vrot.slane %v641_v38, %v5084_v36 }
  0xb9   : > { %7834 = vst [vmem:[#allocation45_spill] sm:$0xff] %v5402_v14  ;;  %7835 = vst [vmem:[#allocation46_spill] sm:$0xff] %v5405_v46  ;;  %v5419_v55 = vrot.slane %v5383_v23, %v5100_v43  ;;  %v2769_v16 = vrot.slane %v2753_v8, %v5084_v36  ;;  %v2795_v40 = vrot.slane %v444_v19, %v5084_v36 }
  0xba   : > { %7836 = vst [vmem:[#allocation47_spill] sm:$0xff] %v5408_v60  ;;  %v2788_v60 = vcombine.high %v444_v19, %v444_v19  ;;  %v5424_v10 = vrot.slane %v637_v2, %v5100_v43  ;;  %v5428_v24 = vrot.slane %v5380_v12, %v5100_v43  ;;  %v5431_v38 = vrot.slane %v2755_v37, %v5084_v36 }
  0xbb   : > { %7837 = vst [vmem:[#allocation48_spill] sm:$0xff] %v5419_v55  ;;  %v656_v44 = vcombine.high %v648_v11, %v648_v11  ;;  %v2784_v55 = vcombine.high %v2762_v56, %v2762_v56  ;;  %v5436_v8 = vrot.slane %v2762_v56, %v5100_v43  ;;  %v690_v3 = vcombine.high %v474_v4, %v474_v4 }
  0xbc   : > { %7838 = vst [vmem:[#allocation49_spill] sm:$0xff] %v5424_v10  ;;  %7839 = vst [vmem:[#allocation50_spill] sm:$0xff] %v5428_v24  ;;  %v2786_v19 = vcombine.high %v2776_v9, %v2776_v9  ;;  %v657_v18 = vcombine.high %v655_v51, %v655_v51  ;;  %v664_v2 = vrot.slane %v648_v11, %v5084_v36 }
  0xbd   : > { %v2802_v10 = vrot.slane %v2788_v60, %v5084_v36  ;;  %v2785_v12 = vcombine.high %v2769_v16, %v2769_v16  ;;  %v5441_v24 = vrot.slane %v2776_v9, %v5100_v43  ;;  %v5444_v37 = vrot.slane %v655_v51, %v5084_v36  ;;  %v445_v60 = vpop.trf.xlu1 }
  0xbe   : > { %v2803_v39 = vcombine.high %v2795_v40, %v2795_v40  ;;  %v5449_v56 = vrot.slane %v2769_v16, %v5100_v43  ;;  %v5452_v46 = vrot.slane %v656_v44, %v5084_v36  ;;  %v2811_v11 = vrot.slane %v2795_v40, %v5084_v36 }
  0xbf   : > { %7840 = vst [vmem:[#allocation51_spill] sm:$0xff] %v5444_v37  ;;  %v5456_v25 = vrot.slane %v2784_v55, %v5100_v43  ;;  %v5460_v9 = vrot.slane %v5431_v38, %v5100_v43  ;;  %v697_v51 = vrot.slane %v474_v4, %v5084_v36  ;;  %v704_v23 = vrot.slane %v690_v3, %v5084_v36 }
  0xc0   : > { %7841 = vst [vmem:[#allocation52_spill] sm:$0xff] %v5449_v56  ;;  %7842 = vst [vmem:[#allocation53_spill] sm:$0xff] %v5452_v46  ;;  %v5465_v16 = vrot.slane %v2786_v19, %v5100_v43  ;;  %v5468_v44 = vrot.slane %v657_v18, %v5084_v36  ;;  %v686_v32 = vcombine.high %v664_v2, %v664_v2 }
  0xc1   : > { %7843 = vst [vmem:[#allocation54_spill] sm:$0xff] %v5460_v9  ;;  %v2804_v40 = vcombine.high %v2802_v10, %v2802_v10  ;;  %v5471_v30 = vrot.slane %v2785_v12, %v5100_v43  ;;  %v5476_v17 = vrot.slane %v664_v2, %v5100_v43  ;;  %v2825_v4 = vrot.slane %v2803_v39, %v5084_v36 }
  0xc2   : > { %7844 = vst [vmem:[#allocation55_spill] sm:$0xff] %v5468_v44  ;;  %v5483_v18 = vrot.slane %v5452_v46, %v5100_v43  ;;  %v5486_v19 = vrot.slane %v2802_v10, %v5084_v36  ;;  %v2833_v12 = vcombine.high %v2811_v11, %v2811_v11  ;;  %v5490_v5 = vrot.slane %v5444_v37, %v5100_v43 }
  0xc3   : > { %7845 = vst [vmem:[#allocation56_spill] sm:$0xff] %v5471_v30  ;;  %7846 = vst [vmem:[#allocation57_spill] sm:$0xff] %v5476_v17  ;;  %v705_v55 = vcombine.high %v697_v51, %v697_v51  ;;  %v706_v2 = vcombine.high %v704_v23, %v704_v23  ;;  %v2837_v17 = vcombine.high %v445_v60, %v445_v60 }
  0xc4   : > { %7847 = vst [vmem:[#allocation58_spill] sm:$0xff] %v5483_v18  ;;  %7848 = vst [vmem:[#allocation59_spill] sm:$0xff] %v5486_v19  ;;  %v5495_v3 = vrot.slane %v686_v32, %v5100_v43  ;;  %v5498_v46 = vrot.slane %v2804_v40, %v5084_v36  ;;  %v2844_v10 = vrot.slane %v445_v60, %v5084_v36 }
  0xc5   : > { %7849 = vst [vmem:[#allocation60_spill] sm:$0xff] %v5490_v5  ;;  %v2835_v57 = vcombine.high %v2825_v4, %v2825_v4  ;;  %v5502_v6 = vrot.slane %v2811_v11, %v5100_v43  ;;  %v713_v5 = vrot.slane %v697_v51, %v5084_v36  ;;  %v720_v37 = vrot.slane %v704_v23, %v5084_v36 }
  0xc6   : > { %7850 = vst [vmem:[#allocation61_spill] sm:$0xff] %v5495_v3  ;;  %7851 = vst [vmem:[#allocation62_spill] sm:$0xff] %v5498_v46  ;;  %v1213_v18 = vpop.permute.xlu1 %1212  ;;  %v5509_v32 = vrot.slane %v2825_v4, %v5100_v43  ;;  %v5512_v40 = vrot.slane %v2833_v12, %v5100_v43  ;;  %v5516_v60 = vrot.slane %v5486_v19, %v5100_v43 }
  0xc7   : > { %7852 = vst [vmem:[#allocation63_spill] sm:$0xff] %v5502_v6  ;;  %v727_v11 = vrot.slane %v705_v55, %v5084_v36  ;;  %v734_v44 = vrot.slane %v706_v2, %v5084_v36  ;;  %v2851_v51 = vrot.slane %v2837_v17, %v5084_v36  ;;  %v1368_v23 = vrot.slane %v1213_v18, %v5147_v27 }
  0xc8   : > { %7853 = vst [vmem:[#allocation64_spill] sm:$0xff] %v5509_v32  ;;  %7854 = vst [vmem:[#allocation65_spill] sm:$0xff] %v5512_v40  ;;  %v2852_v4 = vcombine.high %v2844_v10, %v2844_v10  ;;  %v1375_v3 = vrot.slane %v1213_v18, %v5150_v28  ;;  %v1382_v12 = vrot.slane %v1213_v18, %v5153_v33 }
  0xc9   : > { %7855 = vst [vmem:[#allocation66_spill] sm:$0xff] %v5516_v60  ;;  %v5527_v40 = vrot.slane %v2835_v57, %v5100_v43  ;;  %v735_v19 = vcombine.high %v713_v5, %v713_v5  ;;  %v736_v60 = vcombine.high %v720_v37, %v720_v37  ;;  %v5530_v55 = vrot.slane %v713_v5, %v5100_v43  ;;  %v475_v57 = vpop.trf.xlu0 }
  0xca   : > { %v5533_v17 = vrot.slane %v720_v37, %v5100_v43  ;;  %v2860_v2 = vrot.slane %v2844_v10, %v5084_v36  ;;  %v7857_v39 = vcombine.high %v5259_v41, %v5259_v41  ;;  %v1389_v32 = vrot.slane %v1213_v18, %v5156_v34 }
  0xcb   : > { %7856 = vst [vmem:[#allocation67_spill] sm:$0xff] %v5527_v40  ;;  %v737_v40 = vcombine.high %v727_v11, %v727_v11  ;;  %v738_v6 = vcombine.high %v734_v44, %v734_v44  ;;  %v2853_v61 = vcombine.high %v2851_v51, %v2851_v51  ;;  %vm5544_vm0 = vcmp.eq.f32.partialorder %v5282_v15, %v1368_v23 }
  0xcc   : > { %v5540_v46 = vrot.slane %v7857_v39, %v5100_v43  ;;  %v2874_v37 = vrot.slane %v2852_v4, %v5084_v36  ;;  %vm5550_vm1 = vcmp.eq.f32.partialorder %v5299_v20, %v1375_v3  ;;  %vm5555_vm2 = vcmp.eq.f32.partialorder %v5306_v45, %v1382_v12 }
  0xcd   : > { %v5565_v39 = vrot.slane %v727_v11, %v5100_v43  ;;  %v2867_v23 = vrot.slane %v2851_v51, %v5084_v36  ;;  %v7867_v3 = vcombine.high %v5161_v35, %v5161_v35  ;;  %v739_v12 = vcombine.high %v475_v57, %v475_v57 }
  0xce   : > { %7858 = vst [vmem:[#allocation68_spill] sm:$0xff] %v5540_v46  ;;  %vm5560_vm3 = vcmp.eq.f32.partialorder %v5540_v46, %v1389_v32  ;;  %v5575_v58 = vrot.slane %v735_v19, %v5100_v43  ;;  %v5578_v32 = vrot.slane %v734_v44, %v5100_v43  ;;  %v2882_v49 = vcombine.high %v2860_v2, %v2860_v2 }
  0xcf   : > { %v5572_v4 = vrot.slane %v7867_v3, %v5100_v43  ;;  %v3210_v11 = vsel %vm5544_vm0, %v5183_v54, 0.0  ;;  %v3211_v51 = vsel %vm5550_vm1, %v5197_v63, 0.0  ;;  %v3212_v35 = vsel %vm5555_vm2, %v5200_v0, 0.0  ;;  %v1277_v63 = vpop.permute.xlu1 %1276 }
  0xd0   : > { %7869 = vst [vmem:[#allocation70_spill] sm:$0xff] %v5575_v58  ;;  %v746_v44 = vrot.slane %v475_v57, %v5084_v36  ;;  %v5594_v3 = vrot.slane %v736_v60, %v5100_v43  ;;  %v5597_v5 = vrot.slane %v2853_v61, %v5084_v36  ;;  %v2884_v54 = vcombine.high %v2874_v37, %v2874_v37 }
  0xd1   : > { %7868 = vst [vmem:[#allocation69_spill] sm:$0xff] %v5572_v4  ;;  %v3213_v19 = vsel %vm5560_vm3, %v5572_v4, 0.0  ;;  %v753_v10 = vrot.slane %v739_v12, %v5084_v36  ;;  %v5601_v46 = vrot.slane %v737_v40, %v5100_v43  ;;  %v2883_v41 = vcombine.high %v2867_v23, %v2867_v23 }
  0xd2   : > { %7870 = vst [vmem:[#allocation71_spill] sm:$0xff] %v5597_v5  ;;  %v5604_v0 = vrot.slane %v2860_v2, %v5100_v43  ;;  %v5607_v18 = vrot.slane %v2874_v37, %v5100_v43  ;;  %v5610_v60 = vrot.slane %v2882_v49, %v5100_v43  ;;  %v5613_v61 = vrot.slane %v2867_v23, %v5100_v43 }
  0xd3   : > { %7871 = vst [vmem:[#allocation72_spill] sm:$0xff] %v5601_v46  ;;  %v5615_v57 = vcombine.low %v3210_v11, %v3211_v51  ;;  %v5617_v12 = vcombine.low %v3212_v35, %v3213_v19  ;;  %v754_v4 = vcombine.high %v746_v44, %v746_v44  ;;  %v762_v40 = vrot.slane %v746_v44, %v5084_v36 }
  0xd4   : > { %7872 = vst [vmem:[#allocation73_spill] sm:$0xff] %v5604_v0  ;;  %7873 = vst [vmem:[#allocation74_spill] sm:$0xff] %v5607_v18  ;;  %v1816_v45 = vrot.slane %v1277_v63, %v5147_v27  ;;  %v1823_v2 = vrot.slane %v1277_v63, %v5150_v28  ;;  %v5625_v49 = vrot.slane %v2884_v54, %v5100_v43  ;;  %v1281_v54 = vpop.permute.xlu1 %1280 }
  0xd5   : > { %7874 = vst [vmem:[#allocation75_spill] sm:$0xff] %v5610_v60  ;;  %7875 = vst [vmem:[#allocation76_spill] sm:$0xff] %v5613_v61  ;;  %v5629_v23 = vrot.slane %v5597_v5, %v5100_v43  ;;  %v755_v11 = vcombine.high %v753_v10, %v753_v10  ;;  %v769_v51 = vrot.slane %v753_v10, %v5084_v36  ;;  %v476_v61 = vpop.trf.xlu0 }
  0xd6   : > { %7876 = vst [vmem:[#allocation77_spill] sm:$0xff] %v5615_v57  ;;  %7877 = vst [vmem:[#allocation78_spill] sm:$0xff] %v5617_v12  ;;  %v5633_v35 = vrot.slane %v738_v6, %v5100_v43  ;;  %v1830_v19 = vrot.slane %v1277_v63, %v5153_v33  ;;  %v1837_v44 = vrot.slane %v1277_v63, %v5156_v34 }
  0xd7   : > { %7878 = vst [vmem:[#allocation79_spill] sm:$0xff] %v5625_v49  ;;  %7879 = vst [vmem:[#allocation80_spill] sm:$0xff] %v5629_v23  ;;  %v5638_v37 = vrot.slane %v2883_v41, %v5100_v43  ;;  %v7881_v10 = vcombine.high %v5366_v7, %v5366_v7  ;;  %v776_v5 = vrot.slane %v754_v4, %v5084_v36 }
  0xd8   : > { %v784_v49 = vcombine.high %v762_v40, %v762_v40  ;;  %vm5652_vm4 = vcmp.eq.f32.partialorder %v5533_v17, %v1816_v45  ;;  %vm5657_vm5 = vcmp.eq.f32.partialorder %v5578_v32, %v1823_v2  ;;  %v5662_v23 = vrot.slane %v755_v11, %v5084_v36 }
  0xd9   : > { %7880 = vst [vmem:[#allocation81_spill] sm:$0xff] %v5638_v37  ;;  %v5648_v6 = vrot.slane %v7881_v10, %v5100_v43  ;;  %v5665_v7 = vrot.slane %v762_v40, %v5100_v43  ;;  %v788_v10 = vcombine.high %v476_v61, %v476_v61  ;;  %v795_v4 = vrot.slane %v476_v61, %v5084_v36  ;;  %v477_v2 = vpop.trf.xlu0 }
  0xda   : > { %v785_v37 = vcombine.high %v769_v51, %v769_v51  ;;  %v5669_v45 = vrot.slane %v769_v51, %v5100_v43  ;;  %vm5672_vm6 = vcmp.eq.f32.partialorder %v5594_v3, %v1830_v19  ;;  %vm5677_vm7 = vcmp.eq.f32.partialorder %v5633_v35, %v1837_v44 }
  0xdb   : > { %v3274_v40 = vsel %vm5652_vm4, %v5377_v22, 0.0  ;;  %v3275_v61 = vsel %vm5657_vm5, %v5395_v31, 0.0  ;;  %v1844_v11 = vrot.slane %v1281_v54, %v5147_v27  ;;  %v1851_v51 = vrot.slane %v1281_v54, %v5150_v28 }
  0xdc   : > { %v786_v19 = vcombine.high %v776_v5, %v776_v5  ;;  %v5690_v18 = vrot.slane %v776_v5, %v5100_v43  ;;  %v1858_v44 = vrot.slane %v1281_v54, %v5153_v33  ;;  %v1865_v0 = vrot.slane %v1281_v54, %v5156_v34 }
  0xdd   : > { %v3276_v63 = vsel %vm5672_vm6, %v5398_v26, 0.0  ;;  %v3277_v41 = vsel %vm5677_vm7, %v5648_v6, 0.0  ;;  %v802_v57 = vrot.slane %v788_v10, %v5084_v36  ;;  %v803_v12 = vcombine.high %v795_v4, %v795_v4 }
  0xde   : > { %v5704_v5 = vrot.slane %v784_v49, %v5100_v43  ;;  %v5708_v54 = vrot.slane %v5662_v23, %v5100_v43  ;;  %v5710_v15 = vcombine.low %v3274_v40, %v3275_v61  ;;  %v5713_v30 = vrot.slane %v785_v37, %v5100_v43  ;;  %v1285_v61 = vpop.permute.xlu1 %1284 }
  0xdf   : > { %v811_v60 = vrot.slane %v795_v4, %v5084_v36  ;;  %vm5717_vm8 = vcmp.eq.f32.partialorder %v5530_v55, %v1844_v11  ;;  %vm5722_vm9 = vcmp.eq.f32.partialorder %v5565_v39, %v1851_v51  ;;  %v5727_v20 = vrot.slane %v786_v19, %v5100_v43 }
  0xe0   : > { %7890 = vst [vmem:[#allocation82_spill] sm:$0xff] %v5710_v15  ;;  %v5729_v40 = vcombine.low %v3276_v63, %v3277_v41  ;;  %vm5732_vm10 = vcmp.eq.f32.partialorder %v5575_v58, %v1858_v44  ;;  %vm5737_vm11 = vcmp.eq.f32.partialorder %v5601_v46, %v1865_v0  ;;  %v804_v11 = vcombine.high %v802_v57, %v802_v57 }
  0xe1   : > { %v825_v51 = vrot.slane %v803_v12, %v5084_v36  ;;  %v837_v9 = vcombine.high %v477_v2, %v477_v2  ;;  %v844_v19 = vrot.slane %v477_v2, %v5084_v36  ;;  %v5746_v44 = vrot.slane %v802_v57, %v5084_v36 }
  0xe2   : > { %v3278_v0 = vsel %vm5717_vm8, %v5374_v13, 0.0  ;;  %v3279_v41 = vsel %vm5722_vm9, %v5388_v42, 0.0  ;;  %v833_v46 = vcombine.high %v811_v60, %v811_v60  ;;  %v3280_v12 = vsel %vm5732_vm10, %v5391_v48, 0.0 }
  0xe3   : > { %7899 = vst [vmem:[#allocation83_spill] sm:$0xff] %v5746_v44  ;;  %v3281_v2 = vsel %vm5737_vm11, %v5402_v14, 0.0  ;;  %v1872_v57 = vrot.slane %v1285_v61, %v5147_v27  ;;  %v851_v63 = vrot.slane %v837_v9, %v5084_v36  ;;  %v852_v15 = vcombine.high %v844_v19, %v844_v19 }
  0xe4   : > { %v1879_v10 = vrot.slane %v1285_v61, %v5150_v28  ;;  %v1886_v13 = vrot.slane %v1285_v61, %v5153_v33  ;;  %v5767_v42 = vrot.slane %v804_v11, %v5084_v36  ;;  %v835_v37 = vcombine.high %v825_v51, %v825_v51 }
  0xe5   : > { %v5769_v48 = vcombine.low %v3278_v0, %v3279_v41  ;;  %v5772_v4 = vrot.slane %v811_v60, %v5100_v43  ;;  %v5774_v14 = vcombine.low %v3280_v12, %v3281_v2  ;;  %v860_v9 = vrot.slane %v844_v19, %v5084_v36 }
  0xe6   : > { %7900 = vst [vmem:[#allocation84_spill] sm:$0xff] %v5767_v42  ;;  %v1893_v56 = vrot.slane %v1285_v61, %v5156_v34  ;;  %v5781_v49 = vrot.slane %v825_v51, %v5100_v43  ;;  %v5784_v11 = vrot.slane %v833_v46, %v5100_v43  ;;  %vm5787_vm12 = vcmp.eq.f32.partialorder %v5533_v17, %v1872_v57  ;;  %v1289_v57 = vpop.permute.xlu1 %1288 }
  0xe7   : > { %v853_v60 = vcombine.high %v851_v63, %v851_v63  ;;  %v874_v41 = vrot.slane %v852_v15, %v5084_v36  ;;  %vm5793_vm13 = vcmp.eq.f32.partialorder %v5578_v32, %v1879_v10  ;;  %vm5798_vm14 = vcmp.eq.f32.partialorder %v5594_v3, %v1886_v13  ;;  %v1209_v32 = vpop.permute.xlu0 %1208 }
  0xe8   : > { %v5805_v17 = vrot.slane %v835_v37, %v5100_v43  ;;  %v5809_v19 = vrot.slane %v5746_v44, %v5100_v43  ;;  %v867_v3 = vrot.slane %v851_v63, %v5084_v36  ;;  %v882_v12 = vcombine.high %v860_v9, %v860_v9 }
  0xe9   : > { %vm5817_vm15 = vcmp.eq.f32.partialorder %v5633_v35, %v1893_v56  ;;  %v5822_v10 = vrot.slane %v860_v9, %v5100_v43  ;;  %v3282_v37 = vsel %vm5787_vm12, %v5377_v22, 0.0  ;;  %v3283_v46 = vsel %vm5793_vm13, %v5395_v31, 0.0 }
  0xea   : > { %7907 = vst [vmem:[#allocation85_spill] sm:$0xff] %v5809_v19  ;;  %v3284_v63 = vsel %vm5798_vm14, %v5398_v26, 0.0  ;;  %v5834_v56 = vrot.slane %v853_v60, %v5084_v36  ;;  %v884_v35 = vcombine.high %v874_v41, %v874_v41  ;;  %v1340_v58 = vrot.slane %v1209_v32, %v5147_v27 }
  0xeb   : > { %7910 = vst [vmem:[#allocation86_spill] sm:$0xff] %v5822_v10  ;;  %v1347_v9 = vrot.slane %v1209_v32, %v5150_v28  ;;  %v3285_v22 = vsel %vm5817_vm15, %v5648_v6, 0.0  ;;  %v1354_v0 = vrot.slane %v1209_v32, %v5153_v33  ;;  %v1361_v31 = vrot.slane %v1209_v32, %v5156_v34 }
  0xec   : > { %7911 = vst [vmem:[#allocation87_spill] sm:$0xff] %v5834_v56  ;;  %v1900_v61 = vrot.slane %v1289_v57, %v5147_v27  ;;  %v883_v51 = vcombine.high %v867_v3, %v867_v3  ;;  %v1907_v26 = vrot.slane %v1289_v57, %v5150_v28  ;;  %v1914_v36 = vrot.slane %v1289_v57, %v5153_v33 }
  0xed   : > { %v1921_v60 = vrot.slane %v1289_v57, %v5156_v34  ;;  %v5848_v15 = vrot.slane %v874_v41, %v5100_v43  ;;  %v5851_v13 = vrot.slane %v882_v12, %v5100_v43  ;;  %v5854_v6 = vrot.slane %v867_v3, %v5100_v43  ;;  %v1273_v12 = vpop.permute.xlu0 %1272 }
  0xee   : > { %v5856_v2 = vcombine.low %v3282_v37, %v3283_v46  ;;  %v5860_v44 = vcombine.low %v3284_v63, %v3285_v22  ;;  %vm5863_vm0 = vcmp.eq.f32.partialorder %v5273_v62, %v1340_v58  ;;  %vm5868_vm1 = vcmp.eq.f32.partialorder %v5276_v1, %v1347_v9  ;;  %v1293_v22 = vpop.permute.xlu1 %1292 }
  0xef   : > { %7912 = vst [vmem:[#allocation88_spill] sm:$0xff] %v5848_v15  ;;  %7913 = vst [vmem:[#allocation89_spill] sm:$0xff] %v5851_v13  ;;  %v5873_v3 = vrot.slane %v884_v35, %v5100_v43  ;;  %vm5876_vm2 = vcmp.eq.f32.partialorder %v5288_v21, %v1354_v0  ;;  %vm5881_vm3 = vcmp.eq.f32.partialorder %v5295_v29, %v1361_v31  ;;  %v7962_v15 = vld [vmem:[#allocation40_spill] sm:$0xff] }
  0xf0   : > { %7914 = vst [vmem:[#allocation90_spill] sm:$0xff] %v5854_v6  ;;  %vm5886_vm4 = vcmp.eq.f32.partialorder %v5665_v7, %v1900_v61  ;;  %v5892_v37 = vrot.slane %v5834_v56, %v5100_v43  ;;  %vm5895_vm5 = vcmp.eq.f32.partialorder %v5690_v18, %v1907_v26  ;;  %vm5900_vm6 = vcmp.eq.f32.partialorder %v5704_v5, %v1914_v36 }
  0xf1   : > { %7919 = vst [vmem:[#allocation91_spill] sm:$0xff] %v5873_v3  ;;  %vm5905_vm7 = vcmp.eq.f32.partialorder %v5727_v20, %v1921_v60  ;;  %v5910_v0 = vrot.slane %v883_v51, %v5100_v43  ;;  %v3206_v61 = vsel %vm5863_vm0, %v5168_v47, 0.0  ;;  %v3207_v26 = vsel %vm5868_vm1, %v5177_v52, 0.0  ;;  %v1217_v63 = vpop.permute.xlu0 %1216  ;;  %v7956_v3 = vld [vmem:[#allocation72_spill] sm:$0xff] }
  0xf2   : > { %7926 = vst [vmem:[#allocation92_spill] sm:$0xff] %v5892_v37  ;;  %v3208_v60 = vsel %vm5876_vm2, %v5180_v53, 0.0  ;;  %v3209_v51 = vsel %vm5881_vm3, %v5192_v59, 0.0  ;;  %v3286_v42 = vsel %vm5886_vm4, %v5436_v8, 0.0  ;;  %v3287_v41 = vsel %vm5895_vm5, %v5441_v24, 0.0 }
  0xf3   : > { %7933 = vst [vmem:[#allocation93_spill] sm:$0xff] %v5910_v0  ;;  %v3288_v32 = vsel %vm5900_vm6, %v5456_v25, 0.0  ;;  %v3289_v46 = vsel %vm5905_vm7, %v5465_v16, 0.0  ;;  %v1928_v31 = vrot.slane %v1293_v22, %v5147_v27  ;;  %v5941_v58 = vcombine.low %v3206_v61, %v3207_v26 }
  0xf4   : > { %v1788_v36 = vrot.slane %v1273_v12, %v5147_v27  ;;  %v1935_v57 = vrot.slane %v1293_v22, %v5150_v28  ;;  %v1942_v0 = vrot.slane %v1293_v22, %v5153_v33  ;;  %v1795_v37 = vrot.slane %v1273_v12, %v5150_v28 }
  0xf5   : > { %v1802_v35 = vrot.slane %v1273_v12, %v5153_v33  ;;  %v7934_v9 = vcombine.high %v5662_v23, %v5662_v23  ;;  %v1949_v61 = vrot.slane %v1293_v22, %v5156_v34  ;;  %v5955_v26 = vcombine.low %v3286_v42, %v3287_v41  ;;  %v1297_v23 = vpop.permute.xlu1 %1296  ;;  %v1221_v10 = vpop.permute.xlu0 %1220 }
  0xf6   : > { %v5957_v56 = vcombine.low %v3288_v32, %v3289_v46  ;;  %v1809_v19 = vrot.slane %v1273_v12, %v5156_v34  ;;  %vm5961_vm8 = vcmp.eq.f32.partialorder %v5669_v45, %v1928_v31  ;;  %vm5966_vm9 = vcmp.eq.f32.partialorder %v5708_v54, %v1935_v57  ;;  %v7953_v57 = vld [vmem:[#allocation52_spill] sm:$0xff]  ;;  %v7973_v46 = vld [vmem:[#allocation45_spill] sm:$0xff] }
  0xf7   : > { %v5952_v6 = vrot.slane %v7934_v9, %v5100_v43  ;;  %7935 = vst [vmem:[#allocation94_spill] sm:$0xff] %v5955_v26  ;;  %vm5971_vm10 = vcmp.eq.f32.partialorder %v5713_v30, %v1942_v0  ;;  %v1396_v12 = vrot.slane %v1217_v63, %v5147_v27  ;;  %v5981_v22 = vcombine.low %v3208_v60, %v3209_v51  ;;  %v7950_v60 = vld [vmem:[#allocation70_spill] sm:$0xff] }
  0xf8   : > { %7936 = vst [vmem:[#allocation95_spill] sm:$0xff] %v5957_v56  ;;  %vm5984_vm12 = vcmp.eq.f32.partialorder %v5530_v55, %v1788_v36  ;;  %v7947_v0 = vcombine.high %v5431_v38, %v5431_v38  ;;  %v1403_v41 = vrot.slane %v1217_v63, %v5150_v28  ;;  %vm5996_vm13 = vcmp.eq.f32.partialorder %v5565_v39, %v1795_v37  ;;  %v7954_v9 = vld [vmem:[#allocation54_spill] sm:$0xff]  ;;  %v7955_v37 = vld [vmem:[#allocation56_spill] sm:$0xff]  ;;  %v8045_v56 = vld [vmem:[#allocation11_spill] sm:$0xff] }
  0xf9   : > { %vm5976_vm11 = vcmp.eq.f32.partialorder %v5952_v6, %v1949_v61  ;;  %vm6001_vm14 = vcmp.eq.f32.partialorder %v7950_v60, %v1802_v35  ;;  %v1410_v55 = vrot.slane %v1217_v63, %v5153_v33  ;;  %v1417_v36 = vrot.slane %v1217_v63, %v5156_v34  ;;  %v7963_v63 = vld [vmem:[#allocation43_spill] sm:$0xff]  ;;  %v1237_v13 = vpop.permute.xlu1 %1236 }
  0xfa   : > { %v5992_v42 = vrot.slane %v7947_v0, %v5100_v43  ;;  %v3290_v38 = vsel %vm5961_vm8, %v7953_v57, 0.0  ;;  %v3291_v39 = vsel %vm5966_vm9, %v7954_v9, 0.0  ;;  %v3292_v61 = vsel %vm5971_vm10, %v7955_v37, 0.0 }
  0xfb   : > { %vm6024_vm15 = vcmp.eq.f32.partialorder %v7956_v3, %v1809_v19  ;;  %vm6029_vm0 = vcmp.eq.f32.partialorder %v5273_v62, %v1396_v12  ;;  %v7961_v32 = vmov 0   ;;  %v3270_v0 = vsel %vm5984_vm12, %v7962_v15, 0.0  ;;  %v7964_v3 = vld [vmem:[#allocation44_spill] sm:$0xff]  ;;  %v7982_v12 = vld [vmem:[#allocation22_spill] sm:$0xff]  ;;  %v7985_v15 = vld [vmem:[#allocation25_spill] sm:$0xff] }
  0xfc   : > { %v3293_v35 = vsel %vm5976_vm11, %v5992_v42, 0.0  ;;  %4299 = vrot.lane.b32.xlu1 %v7961_v32, %s4928_s26  ;;  %v3271_v19 = vsel %vm5996_vm13, %v7963_v63, 0.0  ;;  %v3272_v62 = vsel %vm6001_vm14, %v7964_v3, 0.0  ;;  %vm6045_vm1 = vcmp.eq.f32.partialorder %v5276_v1, %v1403_v41 }
  0xfd   : > { %v6049_v26 = vcombine.low %v3290_v38, %v3291_v39  ;;  %v6051_v32 = vcombine.low %v3292_v61, %v3293_v35  ;;  %vm6054_vm2 = vcmp.eq.f32.partialorder %v5288_v21, %v1410_v55  ;;  %vm6059_vm3 = vcmp.eq.f32.partialorder %v5295_v29, %v1417_v36 }
  0xfe   : > { %v3273_v1 = vsel %vm6024_vm15, %v7973_v46, 0.0  ;;  %v3214_v41 = vsel %vm6029_vm0, %v5168_v47, 0.0  ;;  %v1956_v51 = vrot.slane %v1297_v23, %v5147_v27  ;;  %v1963_v21 = vrot.slane %v1297_v23, %v5150_v28 }
  0xff   : > { %7967 = vst [vmem:[#allocation70_spill] sm:$0xff] %v6049_v26  ;;  %7968 = vst [vmem:[#allocation52_spill] sm:$0xff] %v6051_v32  ;;  %v3215_v55 = vsel %vm6045_vm1, %v5177_v52, 0.0  ;;  %v1970_v29 = vrot.slane %v1297_v23, %v5153_v33  ;;  %v1977_v36 = vrot.slane %v1297_v23, %v5156_v34  ;;  %v1424_v38 = vrot.slane %v1221_v10, %v5147_v27  ;;  %v8043_v26 = vld [vmem:[#allocation77_spill] sm:$0xff] }
 0x100   : > { %v6077_v39 = vcombine.low %v3270_v0, %v3271_v19  ;;  %v3216_v47 = vsel %vm6054_vm2, %v5180_v53, 0.0  ;;  %v3217_v61 = vsel %vm6059_vm3, %v5192_v59, 0.0  ;;  %v1431_v35 = vrot.slane %v1221_v10, %v5150_v28  ;;  %v8002_v53 = vld [vmem:[#allocation4_spill] sm:$0xff] }
 0x101   : > { %v3735_v63 = vcombine.low %v3272_v62, %v3273_v1  ;;  %v1438_v0 = vrot.slane %v1221_v10, %v5153_v33  ;;  %v6091_v23 = vcombine.low %v3214_v41, %v3215_v55  ;;  %vm6094_vm4 = vcmp.eq.f32.partialorder %v5665_v7, %v1956_v51  ;;  %v7988_v41 = vld [vmem:[#allocation27_spill] sm:$0xff]  ;;  %v7991_v55 = vld [vmem:[#allocation68_spill] sm:$0xff]  ;;  %v8005_v62 = vld [vmem:[#allocation38_spill] sm:$0xff] }
 0x102   : > { %vm6099_vm5 = vcmp.eq.f32.partialorder %v5690_v18, %v1963_v21  ;;  %v1445_v19 = vrot.slane %v1221_v10, %v5156_v34  ;;  %v6104_v3 = vcombine.low %v3216_v47, %v3217_v61  ;;  %vm6107_vm6 = vcmp.eq.f32.partialorder %v5704_v5, %v1970_v29  ;;  %v7996_v47 = vld [vmem:[#allocation34_spill] sm:$0xff]  ;;  %v7999_v61 = vld [vmem:[#allocation37_spill] sm:$0xff] }
 0x103   : > { %vm6112_vm7 = vcmp.eq.f32.partialorder %v5727_v20, %v1977_v36  ;;  %vm6117_vm8 = vcmp.eq.f32.partialorder %v7982_v12, %v1424_v38  ;;  %vm6122_vm9 = vcmp.eq.f32.partialorder %v7985_v15, %v1431_v35  ;;  %v1536_v5 = vrot.slane %v1237_v13, %v5147_v27  ;;  %v7994_v36 = vld [vmem:[#allocation30_spill] sm:$0xff]  ;;  %v1225_v15 = vpop.permute.xlu0 %1224  ;;  %v8010_v18 = vld [vmem:[#allocation69_spill] sm:$0xff] }
 0x104   : > { %v1543_v31 = vrot.slane %v1237_v13, %v5150_v28  ;;  %v1550_v46 = vrot.slane %v1237_v13, %v5153_v33  ;;  %v3294_v20 = vsel %vm6094_vm4, %v5436_v8, 0.0  ;;  %v3295_v1 = vsel %vm6099_vm5, %v5441_v24, 0.0 }
 0x105   : > { %vm6136_vm10 = vcmp.eq.f32.partialorder %v7988_v41, %v1438_v0  ;;  %v1557_v21 = vrot.slane %v1237_v13, %v5156_v34  ;;  %vm6142_vm11 = vcmp.eq.f32.partialorder %v7991_v55, %v1445_v19  ;;  %v7995_v8 = vcombine.high %v7994_v36, %v7994_v36  ;;  %v8003_v19 = vld [vmem:[#allocation6_spill] sm:$0xff]  ;;  %v8011_v41 = vld [vmem:[#allocation5_spill] sm:$0xff] }
 0x106   : > { %vm6153_vm12 = vcmp.eq.f32.partialorder %v7996_v47, %v1536_v5  ;;  %vm6158_vm13 = vcmp.eq.f32.partialorder %v7999_v61, %v1543_v31  ;;  %v3296_v0 = vsel %vm6107_vm6, %v5456_v25, 0.0  ;;  %v3297_v13 = vsel %vm6112_vm7, %v5465_v16, 0.0  ;;  %v8004_v31 = vld [vmem:[#allocation7_spill] sm:$0xff]  ;;  %v8013_v36 = vld [vmem:[#allocation10_spill] sm:$0xff] }
 0x107   : > { %v6150_v38 = vrot.slane %v7995_v8, %v5100_v43  ;;  %v3218_v59 = vsel %vm6117_vm8, %v8002_v53, 0.0  ;;  %v3219_v12 = vsel %vm6122_vm9, %v8003_v19, 0.0  ;;  %v3220_v25 = vsel %vm6136_vm10, %v8004_v31, 0.0  ;;  %v8014_v8 = vld [vmem:[#allocation16_spill] sm:$0xff] }
 0x108   : > { %vm6180_vm14 = vcmp.eq.f32.partialorder %v8005_v62, %v1550_v46  ;;  %v3221_v10 = vsel %vm6142_vm11, %v8010_v18, 0.0  ;;  %v8012_v55 = vcombine.high %v8011_v41, %v8011_v41  ;;  %v3234_v46 = vsel %vm6153_vm12, %v8013_v36, 0.0  ;;  %v8017_v18 = vld [vmem:[#allocation17_spill] sm:$0xff] }
 0x109   : > { %vm6185_vm15 = vcmp.eq.f32.partialorder %v6150_v38, %v1557_v21  ;;  %v3235_v21 = vsel %vm6158_vm13, %v8014_v8, 0.0  ;;  %v6204_v53 = vcombine.low %v3294_v20, %v3295_v1  ;;  %v6206_v19 = vcombine.low %v3296_v0, %v3297_v13 }
 0x10a   : > { %v6196_v51 = vrot.slane %v8012_v55, %v5100_v43  ;;  %v6208_v29 = vcombine.low %v3218_v59, %v3219_v12  ;;  %v1452_v31 = vrot.slane %v1225_v15, %v5147_v27  ;;  %v3236_v41 = vsel %vm6180_vm14, %v8017_v18, 0.0  ;;  %v1301_v59 = vpop.permute.xlu1 %1300  ;;  %v8033_v12 = vld [vmem:[#allocation9_spill] sm:$0xff] }
 0x10b   : > { %8015 = vst [vmem:[#allocation54_spill] sm:$0xff] %v6204_v53  ;;  %8016 = vst [vmem:[#allocation56_spill] sm:$0xff] %v6206_v19  ;;  %v1459_v55 = vrot.slane %v1225_v15, %v5150_v28  ;;  %v3470_v20 = vrot.slane %v5941_v58, %v5174_v50  ;;  %v6220_v1 = vcombine.low %v3220_v25, %v3221_v10  ;;  %v1229_v10 = vpop.permute.xlu0 %1228  ;;  %v8037_v25 = vld [vmem:[#allocation82_spill] sm:$0xff] }
 0x10c   : > { %v3237_v24 = vsel %vm6185_vm15, %v6196_v51, 0.0  ;;  %v6222_v35 = vcombine.low %v3234_v46, %v3235_v21  ;;  %v3477_v0 = vrot.slane %v5981_v22, %v5174_v50  ;;  %v3742_v13 = vrot.slane %v6077_v39, %v5174_v50  ;;  %v8020_v46 = vld [vmem:[#allocation33_spill] sm:$0xff]  ;;  %v8023_v21 = vld [vmem:[#allocation35_spill] sm:$0xff] }
 0x10d   : > { %v1466_v7 = vrot.slane %v1225_v15, %v5153_v33  ;;  %v1473_v16 = vrot.slane %v1225_v15, %v5156_v34  ;;  %v3749_v58 = vrot.slane %v3735_v63, %v5174_v50  ;;  %v6237_v22 = vcombine.low %v3236_v41, %v3237_v24 }
 0x10e   : > { %8018 = vst [vmem:[#allocation72_spill] sm:$0xff] %v6222_v35  ;;  %vm6240_vm0 = vcmp.eq.f32.partialorder %v8020_v46, %v1452_v31  ;;  %vm6245_vm1 = vcmp.eq.f32.partialorder %v8023_v21, %v1459_v55  ;;  %v3478_v15 = vcombine.low %v3470_v20, %v3477_v0  ;;  %v1984_v60 = vrot.slane %v1301_v59, %v5147_v27  ;;  %v8026_v55 = vld [vmem:[#allocation36_spill] sm:$0xff]  ;;  %v8029_v20 = vld [vmem:[#allocation39_spill] sm:$0xff]  ;;  %v1305_v53 = vpop.permute.xlu1 %1304 }
 0x10f   : > { %8019 = vst [vmem:[#allocation40_spill] sm:$0xff] %v6237_v22  ;;  %v3750_v63 = vcombine.low %v3742_v13, %v3749_v58  ;;  %v1991_v24 = vrot.slane %v1301_v59, %v5150_v28  ;;  %vm6258_vm2 = vcmp.eq.f32.partialorder %v8026_v55, %v1466_v7  ;;  %vm6263_vm3 = vcmp.eq.f32.partialorder %v8029_v20, %v1473_v16  ;;  %v8032_v31 = vld [vmem:[#allocation8_spill] sm:$0xff] }
 0x110   : > { %v1998_v58 = vrot.slane %v1301_v59, %v5153_v33  ;;  %v3222_v41 = vsel %vm6240_vm0, %v8032_v31, 0.0  ;;  %v3223_v7 = vsel %vm6245_vm1, %v8033_v12, 0.0  ;;  %v2005_v35 = vrot.slane %v1301_v59, %v5156_v34 }
 0x111   : > { %v4861_v13 = vpack.i.bf16 %v3750_v63, %v3478_v15  ;;  %vm6278_vm4 = vcmp.eq.f32.partialorder %v5669_v45, %v1984_v60  ;;  %v1480_v15 = vrot.slane %v1229_v10, %v5147_v27  ;;  %v1487_v63 = vrot.slane %v1229_v10, %v5150_v28 }
 0x112   : > { %v8036_v39 = vrot.slane %v5729_v40, %v5174_v50  ;;  %v8038_v22 = vrot.slane %v8037_v25, %v5174_v50  ;;  %vm6291_vm5 = vcmp.eq.f32.partialorder %v5708_v54, %v1991_v24  ;;  %v1494_v45 = vrot.slane %v1229_v10, %v5153_v33 }
 0x113   : > { %4862 = vxpose.xlu0.b32.start [1/16] (narrow) %v4861_v13, 16  ;;  %v1501_v60 = vrot.slane %v1229_v10, %v5156_v34  ;;  %v8041_v13 = vld [vmem:[#allocation78_spill] sm:$0xff]  ;;  %v8044_v40 = vrot.slane %v8043_v26, %v5174_v50  ;;  %v3224_v25 = vsel %vm6258_vm2, %v8045_v56, 0.0  ;;  %v6309_v24 = vcombine.low %v3222_v41, %v3223_v7 }
 0x114   : > { %v3767_v52 = vcombine.low %v8038_v22, %v8036_v39  ;;  %v8042_v19 = vrot.slane %v8041_v13, %v5174_v50  ;;  %v8046_v22 = vld [vmem:[#allocation12_spill] sm:$0xff]  ;;  %vm6312_vm6 = vcmp.eq.f32.partialorder %v5713_v30, %v1998_v58  ;;  %vm6317_vm7 = vcmp.eq.f32.partialorder %v5952_v6, %v2005_v35  ;;  %v8069_v13 = vld [vmem:[#allocation63_spill] sm:$0xff]  ;;  %v8073_v30 = vld [vmem:[#allocation65_spill] sm:$0xff] }
 0x115   : > { %v3225_v54 = vsel %vm6263_vm3, %v8046_v22, 0.0  ;;  %v3298_v26 = vsel %vm6278_vm4, %v7953_v57, 0.0  ;;  %v3299_v41 = vsel %vm6291_vm5, %v7954_v9, 0.0  ;;  %vm6329_vm8 = vcmp.eq.f32.partialorder %v7996_v47, %v1480_v15 }
 0x116   : > { %v3495_v32 = vcombine.low %v8044_v40, %v8042_v19  ;;  %v2012_v19 = vrot.slane %v1305_v53, %v5147_v27  ;;  %vm6334_vm9 = vcmp.eq.f32.partialorder %v7999_v61, %v1487_v63  ;;  %v2019_v35 = vrot.slane %v1305_v53, %v5150_v28  ;;  %v1233_v61 = vpop.permute.xlu0 %1232 }
 0x117   : > { %vm6340_vm10 = vcmp.eq.f32.partialorder %v8005_v62, %v1494_v45  ;;  %vm6345_vm11 = vcmp.eq.f32.partialorder %v6150_v38, %v1501_v60  ;;  %v2033_v47 = vrot.slane %v1305_v53, %v5156_v34  ;;  %v6351_v0 = vcombine.low %v3224_v25, %v3225_v54  ;;  %v1313_v60 = vpop.permute.xlu1 %1312  ;;  %v8070_v25 = vld [vmem:[#allocation64_spill] sm:$0xff] }
 0x118   : > { %v4863_v5 = vpack.i.bf16 %v3767_v52, %v3495_v32  ;;  %v2026_v32 = vrot.slane %v1305_v53, %v5153_v33  ;;  %v3538_v58 = vrot.slane %v6309_v24, %v5174_v50  ;;  %v3300_v62 = vsel %vm6312_vm6, %v7955_v37, 0.0 }
 0x119   : > { %v3301_v38 = vsel %vm6317_vm7, %v5992_v42, 0.0  ;;  %v6361_v7 = vcombine.low %v3298_v26, %v3299_v41  ;;  %v3226_v53 = vsel %vm6329_vm8, %v8013_v36, 0.0  ;;  %vm6367_vm12 = vcmp.eq.f32.partialorder %v5772_v4, %v2012_v19 }
 0x11a   : > { %4864 = vxpose.xlu0.b32.cont [2/16] (narrow) %v4863_v5, 16  ;;  %vm6372_vm13 = vcmp.eq.f32.partialorder %v5781_v49, %v2019_v35  ;;  %v3227_v42 = vsel %vm6334_vm9, %v8014_v8, 0.0  ;;  %v3228_v37 = vsel %vm6340_vm10, %v8017_v18, 0.0  ;;  %v3229_v36 = vsel %vm6345_vm11, %v6196_v51, 0.0  ;;  %v8074_v35 = vld [vmem:[#allocation67_spill] sm:$0xff] }
 0x11b   : > { %v1508_v63 = vrot.slane %v1233_v61, %v5147_v27  ;;  %vm6387_vm14 = vcmp.eq.f32.partialorder %v5784_v11, %v2026_v32  ;;  %vm6392_vm15 = vcmp.eq.f32.partialorder %v5805_v17, %v2033_v47  ;;  %v1515_v8 = vrot.slane %v1233_v61, %v5150_v28 }
 0x11c   : > { %v8067_v18 = vrot.slane %v6104_v3, %v5174_v50  ;;  %v8068_v51 = vrot.slane %v6091_v23, %v5174_v50  ;;  %v3302_v40 = vsel %vm6367_vm12, %v8069_v13, 0.0  ;;  %v3303_v54 = vsel %vm6372_vm13, %v8070_v25, 0.0 }
 0x11d   : > { %v1522_v10 = vrot.slane %v1233_v61, %v5153_v33  ;;  %v1529_v39 = vrot.slane %v1233_v61, %v5156_v34  ;;  %v6411_v26 = vcombine.low %v3300_v62, %v3301_v38  ;;  %v6413_v3 = vcombine.low %v3226_v53, %v3227_v42  ;;  %v6443_v62 = vpop.permute.xlu0 %1240  ;;  %v8103_v53 = vld [vmem:[#allocation47_spill] sm:$0xff] }
 0x11e   : > { %v3512_v45 = vcombine.low %v8068_v51, %v8067_v18  ;;  %v6415_v5 = vcombine.low %v3228_v37, %v3229_v36  ;;  %v8071_v23 = vrot.slane %v5774_v14, %v5174_v50  ;;  %v8072_v19 = vrot.slane %v5769_v48, %v5174_v50  ;;  %v8109_v36 = vld [vmem:[#allocation50_spill] sm:$0xff] }
 0x11f   : > { %v3304_v6 = vsel %vm6387_vm14, %v8073_v30, 0.0  ;;  %v3305_v57 = vsel %vm6392_vm15, %v8074_v35, 0.0  ;;  %v2068_v9 = vrot.slane %v1313_v60, %v5147_v27  ;;  %v2075_v32 = vrot.slane %v1313_v60, %v5150_v28 }
 0x120   : > { %v3784_v41 = vcombine.low %v8072_v19, %v8071_v23  ;;  %v6431_v47 = vcombine.low %v3302_v40, %v3303_v54  ;;  %vm6434_vm0 = vcmp.eq.f32.partialorder %v8020_v46, %v1508_v63  ;;  %vm6439_vm1 = vcmp.eq.f32.partialorder %v8023_v21, %v1515_v8  ;;  %v8098_v19 = vld [vmem:[#allocation46_spill] sm:$0xff] }
 0x121   : > { %vm6446_vm2 = vcmp.eq.f32.partialorder %v8026_v55, %v1522_v10  ;;  %vm6451_vm3 = vcmp.eq.f32.partialorder %v8029_v20, %v1529_v39  ;;  %v2082_v46 = vrot.slane %v1313_v60, %v5153_v33  ;;  %v2089_v21 = vrot.slane %v1313_v60, %v5156_v34  ;;  %v1245_v60 = vpop.permute.xlu0 %1244 }
 0x122   : > { %8075 = vst [vmem:[#allocation43_spill] sm:$0xff] %v6431_v47  ;;  %v4865_v61 = vpack.i.bf16 %v3784_v41, %v3512_v45  ;;  %v3545_v16 = vrot.slane %v6351_v0, %v5174_v50  ;;  %v6463_v42 = vcombine.low %v3304_v6, %v3305_v57  ;;  %v3230_v37 = vsel %vm6434_vm0, %v8032_v31, 0.0  ;;  %v8099_v6 = vld [vmem:[#allocation41_spill] sm:$0xff] }
 0x123   : > { %vm6471_vm4 = vcmp.eq.f32.partialorder %v5772_v4, %v2068_v9  ;;  %vm6476_vm5 = vcmp.eq.f32.partialorder %v5781_v49, %v2075_v32  ;;  %v3231_v63 = vsel %vm6439_vm1, %v8033_v12, 0.0  ;;  %v3232_v52 = vsel %vm6446_vm2, %v8045_v56, 0.0  ;;  %v8121_v56 = vld [vmem:[#allocation15_spill] sm:$0xff]  ;;  %v8150_v12 = vld [vmem:[#allocation74_spill] sm:$0xff] }
 0x124   : > { %8084 = vst [vmem:[#allocation44_spill] sm:$0xff] %v6463_v42  ;;  %4866 = vxpose.xlu0.b32.cont [3/16] (narrow) %v4865_v61, 16  ;;  %v3233_v4 = vsel %vm6451_vm3, %v8046_v22, 0.0  ;;  %v8089_v31 = vrot.slane %v6220_v1, %v5174_v50  ;;  %v8090_v49 = vrot.slane %v6208_v29, %v5174_v50  ;;  %v3562_v8 = vrot.slane %v6415_v5, %v5174_v50  ;;  %v6509_v1 = vpop.permute.xlu1 %1316  ;;  %v8160_v42 = vld [vmem:[#allocation52_spill] sm:$0xff] }
 0x125   : > { %vm6500_vm6 = vcmp.eq.f32.partialorder %v5784_v11, %v2082_v46  ;;  %vm6505_vm7 = vcmp.eq.f32.partialorder %v5805_v17, %v2089_v21  ;;  %v3310_v18 = vsel %vm6471_vm4, %v8069_v13, 0.0  ;;  %v3311_v11 = vsel %vm6476_vm5, %v8070_v25, 0.0  ;;  %v8106_v21 = vld [vmem:[#allocation48_spill] sm:$0xff] }
 0x126   : > { %v3529_v59 = vcombine.low %v8090_v49, %v8089_v31  ;;  %v8095_v51 = vrot.slane %v5860_v44, %v5174_v50  ;;  %v8096_v17 = vrot.slane %v5856_v2, %v5174_v50  ;;  %v6525_v40 = vcombine.low %v3230_v37, %v3231_v63  ;;  %v8154_v49 = vld [vmem:[#allocation84_spill] sm:$0xff] }
 0x127   : > { %v6527_v54 = vcombine.low %v3232_v52, %v3233_v4  ;;  %v1564_v10 = vrot.slane %v6443_v62, %v5147_v27  ;;  %v1571_v13 = vrot.slane %v6443_v62, %v5150_v28  ;;  %v3312_v25 = vsel %vm6500_vm6, %v8073_v30, 0.0  ;;  %v8112_v52 = vld [vmem:[#allocation49_spill] sm:$0xff] }
 0x128   : > { %v3801_v45 = vcombine.low %v8096_v17, %v8095_v51  ;;  %v3313_v44 = vsel %vm6505_vm7, %v8074_v35, 0.0  ;;  %v1578_v2 = vrot.slane %v6443_v62, %v5153_v33  ;;  %v6541_v23 = vcombine.low %v3310_v18, %v3311_v11  ;;  %v1321_v63 = vpop.permute.xlu1 %1320  ;;  %v8122_v18 = vld [vmem:[#allocation13_spill] sm:$0xff] }
 0x129   : > { %v6545_v41 = vrot.slane %v8098_v19, %v5100_v43  ;;  %v8100_v57 = vcombine.high %v8099_v6, %v8099_v6  ;;  %v1592_v30 = vrot.slane %v1245_v60, %v5147_v27  ;;  %v8101_v35 = vcombine.high %v8098_v19, %v8098_v19  ;;  %v8129_v19 = vld [vmem:[#allocation94_spill] sm:$0xff] }
 0x12a   : > { %v4867_v39 = vpack.i.bf16 %v3801_v45, %v3529_v59  ;;  %8097 = vst [vmem:[#allocation45_spill] sm:$0xff] %v6541_v23  ;;  %v1599_v14 = vrot.slane %v1245_v60, %v5150_v28  ;;  %v1606_v48 = vrot.slane %v1245_v60, %v5153_v33  ;;  %v1613_v61 = vrot.slane %v1245_v60, %v5156_v34  ;;  %v8152_v59 = vld [vmem:[#allocation79_spill] sm:$0xff]  ;;  %v8156_v23 = vld [vmem:[#allocation66_spill] sm:$0xff] }
 0x12b   : > { %v6551_v9 = vrot.slane %v8100_v57, %v5100_v43  ;;  %v6558_v32 = vrot.slane %v8101_v35, %v5100_v43  ;;  %v6563_v38 = vcombine.low %v3312_v25, %v3313_v44  ;;  %vm6566_vm8 = vcmp.eq.f32.partialorder %v8103_v53, %v1564_v10  ;;  %v8125_v10 = vld [vmem:[#allocation18_spill] sm:$0xff]  ;;  %v8126_v25 = vld [vmem:[#allocation19_spill] sm:$0xff] }
 0x12c   : > { %4868 = vxpose.xlu0.b32.cont [4/16] (narrow) %v4867_v39, 16  ;;  %vm6571_vm9 = vcmp.eq.f32.partialorder %v8106_v21, %v1571_v13  ;;  %vm6576_vm10 = vcmp.eq.f32.partialorder %v8109_v36, %v1592_v30  ;;  %vm6581_vm11 = vcmp.eq.f32.partialorder %v8112_v52, %v1578_v2  ;;  %vm6586_vm12 = vcmp.eq.f32.partialorder %v6545_v41, %v1599_v14  ;;  %v8127_v2 = vld [vmem:[#allocation95_spill] sm:$0xff]  ;;  %v8131_v14 = vld [vmem:[#allocation20_spill] sm:$0xff] }
 0x12d   : > { %8102 = vst [vmem:[#allocation22_spill] sm:$0xff] %v6563_v38  ;;  %vm6591_vm13 = vcmp.eq.f32.partialorder %v6551_v9, %v1606_v48  ;;  %vm6596_vm14 = vcmp.eq.f32.partialorder %v6558_v32, %v1613_v61  ;;  %v6602_v22 = vrot.slane %v8121_v56, %v5100_v43  ;;  %v8123_v11 = vcombine.high %v8122_v18, %v8122_v18 }
 0x12e   : > { %v8124_v17 = vcombine.high %v8121_v56, %v8121_v56  ;;  %v3546_v60 = vcombine.low %v3538_v58, %v3545_v16  ;;  %v3238_v13 = vsel %vm6566_vm8, %v8125_v10, 0.0  ;;  %v3242_v44 = vsel %vm6576_vm10, %v8126_v25, 0.0 }
 0x12f   : > { %v6608_v51 = vrot.slane %v8123_v11, %v5100_v43  ;;  %v8128_v39 = vrot.slane %v8127_v2, %v5174_v50  ;;  %v8130_v6 = vrot.slane %v8129_v19, %v5174_v50  ;;  %v2124_v30 = vrot.slane %v1321_v63, %v5147_v27  ;;  %v8132_v11 = vld [vmem:[#allocation86_spill] sm:$0xff]  ;;  %v8138_v19 = vld [vmem:[#allocation21_spill] sm:$0xff] }
 0x130   : > { %v6614_v45 = vrot.slane %v8124_v17, %v5100_v43  ;;  %v3243_v24 = vsel %vm6586_vm12, %v6602_v22, 0.0  ;;  %v2131_v35 = vrot.slane %v1321_v63, %v5150_v28  ;;  %v3239_v48 = vsel %vm6571_vm9, %v8131_v14, 0.0 }
 0x131   : > { %v3818_v57 = vcombine.low %v8130_v6, %v8128_v39  ;;  %v3244_v58 = vsel %vm6591_vm13, %v6608_v51, 0.0  ;;  %v2138_v46 = vrot.slane %v1321_v63, %v5153_v33  ;;  %v2145_v0 = vrot.slane %v1321_v63, %v5156_v34  ;;  %v8135_v63 = vld [vmem:[#allocation88_spill] sm:$0xff]  ;;  %v8149_v39 = vld [vmem:[#allocation73_spill] sm:$0xff] }
 0x132   : > { %v3245_v16 = vsel %vm6596_vm14, %v6614_v45, 0.0  ;;  %v2096_v56 = vrot.slane %v6509_v1, %v5147_v27  ;;  %v3615_v18 = vcombine.low %v3242_v44, %v3243_v24  ;;  %vm6656_vm15 = vcmp.eq.f32.partialorder %v8132_v11, %v2124_v30 }
 0x133   : > { %v4869_v61 = vpack.i.bf16 %v3818_v57, %v3546_v60  ;;  %v3616_v37 = vcombine.low %v3244_v58, %v3245_v16  ;;  %vm6661_vm0 = vcmp.eq.f32.partialorder %v8135_v63, %v2131_v35  ;;  %v6672_v6 = vcombine.low %v3238_v13, %v3239_v48  ;;  %v1309_v57 = vpop.permute.xlu0 %1308  ;;  %v8140_v58 = vld [vmem:[#allocation89_spill] sm:$0xff]  ;;  %v8143_v35 = vld [vmem:[#allocation91_spill] sm:$0xff] }
 0x134   : > { %v2103_v30 = vrot.slane %v6509_v1, %v5150_v28  ;;  %v2110_v24 = vrot.slane %v6509_v1, %v5153_v33  ;;  %vm6679_vm1 = vcmp.eq.f32.partialorder %v8140_v58, %v2138_v46  ;;  %vm6684_vm2 = vcmp.eq.f32.partialorder %v8143_v35, %v2145_v0  ;;  %v8146_v48 = vld [vmem:[#allocation85_spill] sm:$0xff] }
 0x135   : > { %4870 = vxpose.xlu0.b32.cont [5/16] (narrow) %v4869_v61, 16  ;;  %8139 = vst [vmem:[#allocation25_spill] sm:$0xff] %v6672_v6  ;;  %v2117_v13 = vrot.slane %v6509_v1, %v5156_v34  ;;  %vm6691_vm3 = vcmp.eq.f32.partialorder %v8146_v48, %v2096_v56  ;;  %v3318_v46 = vsel %vm6656_vm15, %v8149_v39, 0.0  ;;  %v3319_v29 = vsel %vm6661_vm0, %v8150_v12, 0.0  ;;  %v8151_v56 = vld [vmem:[#allocation75_spill] sm:$0xff]  ;;  %v8162_v6 = vld [vmem:[#allocation70_spill] sm:$0xff] }
 0x136   : > { %v3623_v0 = vrot.slane %v3615_v18, %v5174_v50  ;;  %v3630_v44 = vrot.slane %v3616_v37, %v5174_v50  ;;  %v2040_v15 = vrot.slane %v1309_v57, %v5147_v27  ;;  %v2047_v1 = vrot.slane %v1309_v57, %v5150_v28 }
 0x137   : > { %v3320_v55 = vsel %vm6679_vm1, %v8151_v56, 0.0  ;;  %v3321_v17 = vsel %vm6684_vm2, %v8152_v59, 0.0  ;;  %v2054_v31 = vrot.slane %v1309_v57, %v5153_v33  ;;  %v2061_v60 = vrot.slane %v1309_v57, %v5156_v34  ;;  %v8157_v57 = vld [vmem:[#allocation83_spill] sm:$0xff] }
 0x138   : > { %v6715_v37 = vcombine.low %v3318_v46, %v3319_v29  ;;  %v1101_v20 = vrot.slane %v8154_v49, %v5100_v43  ;;  %v8155_v16 = vrot.slane %v6413_v3, %v5174_v50  ;;  %v3314_v38 = vsel %vm6691_vm3, %v8156_v23, 0.0 }
 0x139   : > { %v8158_v18 = vcombine.high %v8157_v57, %v8157_v57  ;;  %v8159_v46 = vcombine.high %v8154_v49, %v8154_v49  ;;  %v8161_v5 = vrot.slane %v8160_v42, %v5174_v50  ;;  %v8163_v3 = vrot.slane %v8162_v6, %v5174_v50 }
 0x13a   : > { %8153 = vst [vmem:[#allocation27_spill] sm:$0xff] %v6715_v37  ;;  %v3563_v61 = vcombine.low %v8155_v16, %v3562_v8  ;;  %v6742_v16 = vcombine.low %v3623_v0, %v3630_v44  ;;  %v6744_v2 = vcombine.low %v3320_v55, %v3321_v17  ;;  %vm6747_vm4 = vcmp.eq.f32.partialorder %v8146_v48, %v2040_v15  ;;  %v8173_v55 = vld [vmem:[#allocation62_spill] sm:$0xff]  ;;  %v1325_v15 = vpop.permute.xlu1 %1324 }
 0x13b   : > { %v1105_v29 = vrot.slane %v8158_v18, %v5100_v43  ;;  %v1109_v47 = vrot.slane %v8159_v46, %v5100_v43  ;;  %v3835_v8 = vcombine.low %v8163_v3, %v8161_v5  ;;  %vm6751_vm5 = vcmp.eq.f32.partialorder %v1101_v20, %v2047_v1  ;;  %v1249_v3 = vpop.permute.xlu0 %1248  ;;  %v8188_v5 = vld [vmem:[#allocation92_spill] sm:$0xff] }
 0x13c   : > { %8164 = vst [vmem:[#allocation68_spill] sm:$0xff] %v6744_v2  ;;  %v3101_v44 = vrot.slane %v8173_v55, %v5100_v43  ;;  %vm6767_vm8 = vcmp.eq.f32.partialorder %v1101_v20, %v2103_v30  ;;  %v3306_v20 = vsel %vm6747_vm4, %v8156_v23, 0.0  ;;  %v2166_v57 = vrot.slane %v1325_v15, %v5153_v33 }
 0x13d   : > { %vm6755_vm6 = vcmp.eq.f32.partialorder %v1105_v29, %v2054_v31  ;;  %vm6759_vm7 = vcmp.eq.f32.partialorder %v1109_v47, %v2061_v60  ;;  %v4871_v6 = vpack.i.bf16 %v3835_v8, %v3563_v61  ;;  %v8176_v31 = vld [vmem:[#allocation59_spill] sm:$0xff]  ;;  %v8178_v60 = vcombine.high %v8173_v55, %v8173_v55  ;;  %v8185_v61 = vld [vmem:[#allocation90_spill] sm:$0xff] }
 0x13e   : > { %v8177_v1 = vcombine.high %v8176_v31, %v8176_v31  ;;  %vm6779_vm9 = vcmp.eq.f32.partialorder %v1105_v29, %v2110_v24  ;;  %vm6783_vm10 = vcmp.eq.f32.partialorder %v1109_v47, %v2117_v13  ;;  %v3307_v30 = vsel %vm6751_vm5, %v3101_v44, 0.0  ;;  %v1329_v29 = vpop.permute.xlu1 %1328 }
 0x13f   : > { %v3109_v46 = vrot.slane %v8178_v60, %v5100_v43  ;;  %4872 = vxpose.xlu0.b32.cont [6/16] (narrow) %v4871_v6, 16  ;;  %v2152_v47 = vrot.slane %v1325_v15, %v5147_v27  ;;  %v2159_v13 = vrot.slane %v1325_v15, %v5150_v28  ;;  %v3315_v23 = vsel %vm6767_vm8, %v3101_v44, 0.0  ;;  %v8183_v6 = vld [vmem:[#allocation87_spill] sm:$0xff]  ;;  %v1253_v48 = vpop.permute.xlu0 %1252 }
 0x140   : > { %v3105_v17 = vrot.slane %v8177_v1, %v5100_v43  ;;  %v2173_v18 = vrot.slane %v1325_v15, %v5156_v34  ;;  %v6808_v55 = vcombine.low %v3306_v20, %v3307_v30  ;;  %v8184_v31 = vcombine.high %v8183_v6, %v8183_v6  ;;  %v8215_v20 = vld [vmem:[#allocation56_spill] sm:$0xff] }
 0x141   : > { %v3309_v24 = vsel %vm6759_vm7, %v3109_v46, 0.0  ;;  %v3317_v42 = vsel %vm6783_vm10, %v3109_v46, 0.0  ;;  %v1620_v44 = vrot.slane %v1249_v3, %v5147_v27  ;;  %v1627_v15 = vrot.slane %v1249_v3, %v5150_v28 }
 0x142   : > { %v3308_v8 = vsel %vm6755_vm6, %v3105_v17, 0.0  ;;  %v3316_v49 = vsel %vm6779_vm9, %v3105_v17, 0.0  ;;  %v6814_v1 = vrot.slane %v8184_v31, %v5100_v43  ;;  %v1634_v60 = vrot.slane %v1249_v3, %v5153_v33 }
 0x143   : > { %v6816_v0 = vcombine.low %v3308_v8, %v3309_v24  ;;  %v6821_v17 = vcombine.low %v3314_v38, %v3315_v23  ;;  %vm6824_vm12 = vcmp.eq.f32.partialorder %v8185_v61, %v2152_v47  ;;  %vm6829_vm13 = vcmp.eq.f32.partialorder %v8188_v5, %v2159_v13  ;;  %v8191_v8 = vld [vmem:[#allocation71_spill] sm:$0xff]  ;;  %v8193_v38 = vld [vmem:[#allocation93_spill] sm:$0xff]  ;;  %v8198_v13 = vld [vmem:[#allocation42_spill] sm:$0xff] }
 0x144   : > { %v1641_v30 = vrot.slane %v1249_v3, %v5156_v34  ;;  %v8192_v24 = vcombine.high %v8191_v8, %v8191_v8  ;;  %vm6841_vm14 = vcmp.eq.f32.partialorder %v8193_v38, %v2166_v57  ;;  %vm6846_vm15 = vcmp.eq.f32.partialorder %v6814_v1, %v2173_v18  ;;  %v1257_v18 = vpop.permute.xlu0 %1256 }
 0x145   : > { %v8199_v3 = vcombine.high %v8198_v13, %v8198_v13  ;;  %vm6855_vm0 = vcmp.eq.f32.partialorder %v8103_v53, %v1620_v44  ;;  %vm6860_vm1 = vcmp.eq.f32.partialorder %v8106_v21, %v1627_v15  ;;  %vm6865_vm2 = vcmp.eq.f32.partialorder %v8112_v52, %v1634_v60  ;;  %v8209_v15 = vld [vmem:[#allocation80_spill] sm:$0xff] }
 0x146   : > { %v6838_v6 = vrot.slane %v8192_v24, %v5100_v43  ;;  %v8206_v24 = vrot.slane %v6527_v54, %v5174_v50  ;;  %v8207_v13 = vrot.slane %v6525_v40, %v5174_v50  ;;  %v6875_v44 = vcombine.low %v3316_v49, %v3317_v42  ;;  %v8212_v54 = vld [vmem:[#allocation81_spill] sm:$0xff]  ;;  %v8213_v42 = vld [vmem:[#allocation14_spill] sm:$0xff] }
 0x147   : > { %v965_v31 = vrot.slane %v8199_v3, %v5100_v43  ;;  %v8208_v3 = vld [vmem:[#allocation76_spill] sm:$0xff]  ;;  %v3323_v52 = vsel %vm6829_vm13, %v8209_v15, 0.0  ;;  %v3324_v40 = vsel %vm6841_vm14, %v8212_v54, 0.0  ;;  %v8214_v46 = vcombine.high %v8213_v42, %v8213_v42 }
 0x148   : > { %v3580_v53 = vcombine.low %v8207_v13, %v8206_v24  ;;  %v3322_v21 = vsel %vm6824_vm12, %v8208_v3, 0.0  ;;  %v3325_v49 = vsel %vm6846_vm15, %v6838_v6, 0.0  ;;  %v8217_v13 = vld [vmem:[#allocation54_spill] sm:$0xff]  ;;  %v8219_v23 = vrot.slane %v6443_v62, %v5156_v34 }
 0x149   : > { %vm6883_vm3 = vcmp.eq.f32.partialorder %v965_v31, %v1641_v30  ;;  %v2965_v24 = vrot.slane %v8214_v46, %v5100_v43  ;;  %v8216_v30 = vrot.slane %v8215_v20, %v5174_v50  ;;  %v8218_v37 = vrot.slane %v8217_v13, %v5174_v50 }
 0x14a   : > { %vm6906_vm4 = vcmp.eq.f32.partialorder %v965_v31, %v8219_v23  ;;  %v3246_v47 = vsel %vm6855_vm0, %v8125_v10, 0.0  ;;  %v3247_v42 = vsel %vm6860_vm1, %v8131_v14, 0.0  ;;  %v3248_v46 = vsel %vm6865_vm2, %v8138_v19, 0.0 }
 0x14b   : > { %v3852_v2 = vcombine.low %v8218_v37, %v8216_v30  ;;  %v3249_v37 = vsel %vm6883_vm3, %v2965_v24, 0.0  ;;  %v2180_v31 = vrot.slane %v1329_v29, %v5147_v27  ;;  %v2187_v20 = vrot.slane %v1329_v29, %v5150_v28 }
 0x14c   : > { %v3895_v8 = vrot.slane %v6808_v55, %v5174_v50  ;;  %v3902_v10 = vrot.slane %v6816_v0, %v5174_v50  ;;  %v2194_v14 = vrot.slane %v1329_v29, %v5153_v33  ;;  %v2201_v57 = vrot.slane %v1329_v29, %v5156_v34  ;;  %v8245_v29 = vld [vmem:[#allocation53_spill] sm:$0xff] }
 0x14d   : > { %v4873_v62 = vpack.i.bf16 %v3852_v2, %v3580_v53  ;;  %v6929_v30 = vcombine.low %v3322_v21, %v3323_v52  ;;  %v6931_v60 = vcombine.low %v3324_v40, %v3325_v49  ;;  %v3241_v2 = vsel %vm6906_vm4, %v2965_v24, 0.0 }
 0x14e   : > { %v3632_v53 = vcombine.low %v3246_v47, %v3247_v42  ;;  %v3633_v13 = vcombine.low %v3248_v46, %v3249_v37  ;;  %v1648_v55 = vrot.slane %v1253_v48, %v5147_v27  ;;  %v1655_v23 = vrot.slane %v1253_v48, %v5150_v28 }
 0x14f   : > { %4874 = vxpose.xlu0.b32.cont [7/16] (narrow) %v4873_v62, 16  ;;  %v1662_v0 = vrot.slane %v1253_v48, %v5153_v33  ;;  %vm6939_vm5 = vcmp.eq.f32.partialorder %v8132_v11, %v2180_v31  ;;  %vm6944_vm6 = vcmp.eq.f32.partialorder %v8135_v63, %v2187_v20  ;;  %v1669_v52 = vrot.slane %v1253_v48, %v5156_v34  ;;  %v1261_v31 = vpop.permute.xlu0 %1260 }
 0x150   : > { %v8226_v54 = vrot.slane %v6411_v26, %v5174_v50  ;;  %v8227_v40 = vrot.slane %v6361_v7, %v5174_v50  ;;  %vm6956_vm7 = vcmp.eq.f32.partialorder %v8140_v58, %v2194_v14  ;;  %vm6961_vm8 = vcmp.eq.f32.partialorder %v8143_v35, %v2201_v57  ;;  %v8234_v26 = vld [vmem:[#allocation40_spill] sm:$0xff] }
 0x151   : > { %vm6966_vm9 = vcmp.eq.f32.partialorder %v8109_v36, %v1648_v55  ;;  %v8235_v24 = vrot.slane %v8234_v26, %v5174_v50  ;;  %v8236_v7 = vld [vmem:[#allocation72_spill] sm:$0xff]  ;;  %v8238_v42 = vsel %vm6581_vm11, %v8138_v19, 0.0  ;;  %vm6981_vm10 = vcmp.eq.f32.partialorder %v6545_v41, %v1655_v23  ;;  %v8250_v26 = vld [vmem:[#allocation58_spill] sm:$0xff]  ;;  %v8259_v36 = vld [vmem:[#allocation31_spill] sm:$0xff] }
 0x152   : > { %v3869_v49 = vcombine.low %v8227_v40, %v8226_v54  ;;  %v8237_v47 = vrot.slane %v8236_v7, %v5174_v50  ;;  %v3599_v35 = vcombine.low %v8238_v42, %v3241_v2  ;;  %vm6986_vm12 = vcmp.eq.f32.partialorder %v6551_v9, %v1662_v0  ;;  %v8254_v42 = vld [vmem:[#allocation61_spill] sm:$0xff] }
 0x153   : > { %vm6991_vm13 = vcmp.eq.f32.partialorder %v6558_v32, %v1669_v52  ;;  %v3640_v4 = vrot.slane %v3632_v53, %v5174_v50  ;;  %v3647_v19 = vrot.slane %v3633_v13, %v5174_v50  ;;  %v3326_v41 = vsel %vm6939_vm5, %v8149_v39, 0.0  ;;  %v1265_v63 = vpop.permute.xlu0 %1264 }
 0x154   : > { %v3597_v58 = vcombine.low %v8237_v47, %v8235_v24  ;;  %v3327_v9 = vsel %vm6944_vm6, %v8150_v12, 0.0  ;;  %v3328_v32 = vsel %vm6956_vm7, %v8151_v56, 0.0  ;;  %v3329_v20 = vsel %vm6961_vm8, %v8152_v59, 0.0  ;;  %v8251_v24 = vld [vmem:[#allocation24_spill] sm:$0xff] }
 0x155   : > { %v3250_v14 = vsel %vm6966_vm9, %v8126_v25, 0.0  ;;  %v3251_v39 = vsel %vm6981_vm10, %v6602_v22, 0.0  ;;  %v3252_v12 = vsel %vm6986_vm12, %v6608_v51, 0.0  ;;  %v3253_v56 = vsel %vm6991_vm13, %v6614_v45, 0.0 }
 0x156   : > { %v4875_v62 = vpack.i.bf16 %v3869_v49, %v3597_v58  ;;  %v1676_v57 = vrot.slane %v1257_v18, %v5147_v27  ;;  %v7022_v59 = vcombine.low %v3895_v8, %v3902_v10  ;;  %v3929_v25 = vrot.slane %v6821_v17, %v5174_v50  ;;  %v7037_v8 = vpop.permute.xlu1 %1332  ;;  %v8247_v49 = vld [vmem:[#allocation57_spill] sm:$0xff]  ;;  %v8253_v58 = vld [vmem:[#allocation28_spill] sm:$0xff] }
 0x157   : > { %v3936_v2 = vrot.slane %v6875_v44, %v5174_v50  ;;  %v3963_v22 = vrot.slane %v6929_v30, %v5174_v50  ;;  %v3970_v51 = vrot.slane %v6931_v60, %v5174_v50  ;;  %v3613_v53 = vrot.slane %v3599_v35, %v5174_v50 }
 0x158   : > { %4876 = vxpose.xlu0.b32.cont [8/16] (narrow) %v4875_v62, 16  ;;  %v7033_v45 = vcombine.low %v3640_v4, %v3647_v19  ;;  %v7035_v13 = vcombine.low %v3326_v41, %v3327_v9  ;;  %v7039_v10 = vcombine.low %v3328_v32, %v3329_v20  ;;  %v3649_v55 = vcombine.low %v3250_v14, %v3251_v39  ;;  %v8260_v4 = vld [vmem:[#allocation25_spill] sm:$0xff]  ;;  %v8262_v20 = vld [vmem:[#allocation44_spill] sm:$0xff]  ;;  %v8264_v39 = vld [vmem:[#allocation43_spill] sm:$0xff] }
 0x159   : > { %v3650_v23 = vcombine.low %v3252_v12, %v3253_v56  ;;  %v1683_v0 = vrot.slane %v1257_v18, %v5150_v28  ;;  %v8246_v21 = vcombine.high %v8245_v29, %v8245_v29  ;;  %v1690_v54 = vrot.slane %v1257_v18, %v5153_v33 }
 0x15a   : > { %v1697_v40 = vrot.slane %v1257_v18, %v5156_v34  ;;  %vm7049_vm11 = vcmp.eq.f32.partialorder %v8247_v49, %v1676_v57  ;;  %v2208_v48 = vrot.slane %v7037_v8, %v5147_v27  ;;  %v8252_v7 = vcombine.high %v8251_v24, %v8251_v24 }
 0x15b   : > { %v997_v52 = vrot.slane %v8246_v21, %v5100_v43  ;;  %vm2407_vm14 = vcmp.eq.f32.partialorder %v8250_v26, %v1683_v0  ;;  %v3254_v18 = vsel %vm7049_vm11, %v8253_v58, 0.0  ;;  %vm7066_vm15 = vcmp.eq.f32.partialorder %v8254_v42, %v1690_v54  ;;  %v8266_v0 = vld [vmem:[#allocation32_spill] sm:$0xff]  ;;  %v8267_v54 = vld [vmem:[#allocation55_spill] sm:$0xff] }
 0x15c   : > { %v7060_v47 = vrot.slane %v8252_v7, %v5100_v43  ;;  %v3255_v37 = vsel %vm2407_vm14, %v8259_v36, 0.0  ;;  %v8261_v19 = vrot.slane %v8260_v4, %v5174_v50  ;;  %v3657_v62 = vrot.slane %v3649_v55, %v5174_v50 }
 0x15d   : > { %vm7070_vm0 = vcmp.eq.f32.partialorder %v997_v52, %v1697_v40  ;;  %v2215_v9 = vrot.slane %v7037_v8, %v5150_v28  ;;  %v2222_v32 = vrot.slane %v7037_v8, %v5153_v33  ;;  %v8263_v14 = vrot.slane %v8262_v20, %v5174_v50  ;;  %v8271_v20 = vld [vmem:[#allocation60_spill] sm:$0xff] }
 0x15e   : > { %v3614_v41 = vcombine.low %v8261_v19, %v3613_v53  ;;  %v8265_v12 = vrot.slane %v8264_v39, %v5174_v50  ;;  %v3664_v57 = vrot.slane %v3650_v23, %v5174_v50  ;;  %v3256_v53 = vsel %vm7066_vm15, %v8266_v0, 0.0  ;;  %v8268_v23 = vld [vmem:[#allocation51_spill] sm:$0xff]  ;;  %v1269_v19 = vpop.permute.xlu0 %1268 }
 0x15f   : > { %v3257_v55 = vsel %vm7070_vm0, %v7060_v47, 0.0  ;;  %v7096_v29 = vcombine.low %v3254_v18, %v3255_v37  ;;  %v1005_v40 = vrot.slane %v8267_v54, %v5100_v43  ;;  %v1704_v11 = vrot.slane %v1261_v31, %v5147_v27 }
 0x160   : > { %v3886_v56 = vcombine.low %v8265_v12, %v8263_v14  ;;  %v1711_v24 = vrot.slane %v1261_v31, %v5150_v28  ;;  %v8269_v7 = vcombine.high %v8268_v23, %v8268_v23  ;;  %v8270_v46 = vcombine.high %v8267_v54, %v8267_v54  ;;  %v8276_v12 = vld [vmem:[#allocation26_spill] sm:$0xff] }
 0x161   : > { %v1718_v18 = vrot.slane %v1261_v31, %v5153_v33  ;;  %v1725_v37 = vrot.slane %v1261_v31, %v5156_v34  ;;  %vm7115_vm1 = vcmp.eq.f32.partialorder %v8271_v20, %v1704_v11  ;;  %vm7128_vm3 = vcmp.eq.f32.partialorder %v8185_v61, %v2208_v48  ;;  %v8283_v11 = vld [vmem:[#allocation23_spill] sm:$0xff] }
 0x162   : > { %v4877_v21 = vpack.i.bf16 %v3886_v56, %v3614_v41  ;;  %v1009_v35 = vrot.slane %v8269_v7, %v5100_v43  ;;  %v1013_v4 = vrot.slane %v8270_v46, %v5100_v43  ;;  %v2229_v41 = vrot.slane %v7037_v8, %v5156_v34 }
 0x163   : > { %vm7119_vm2 = vcmp.eq.f32.partialorder %v1005_v40, %v1711_v24  ;;  %v7125_v56 = vrot.slane %v8276_v12, %v5100_v43  ;;  %v3667_v8 = vcombine.low %v3256_v53, %v3257_v55  ;;  %v8284_v24 = vcombine.high %v8283_v11, %v8283_v11  ;;  %v8286_v53 = vld [vmem:[#allocation29_spill] sm:$0xff] }
 0x164   : > { %4878 = vxpose.xlu0.b32.cont [9/16] (narrow) %v4877_v21, 16  ;;  %vm7132_vm4 = vcmp.eq.f32.partialorder %v1009_v35, %v1718_v18  ;;  %vm7136_vm5 = vcmp.eq.f32.partialorder %v1013_v4, %v1725_v37  ;;  %v8285_v61 = vcombine.high %v8276_v12, %v8276_v12  ;;  %v3258_v55 = vsel %vm7115_vm1, %v8286_v53, 0.0  ;;  %v7164_v12 = vpop.permute.xlu0 %4207 }
 0x165   : > { %v7144_v23 = vrot.slane %v8284_v24, %v5100_v43  ;;  %v3259_v7 = vsel %vm7119_vm2, %v7125_v56, 0.0  ;;  %v4879_v46 = vpack.i.bf16 %v7022_v59, %v6742_v16  ;;  %v3665_v18 = vcombine.low %v3657_v62, %v3664_v57  ;;  %v8297_v24 = vld [vmem:[#allocation45_spill] sm:$0xff] }
 0x166   : > { %v7150_v48 = vrot.slane %v8285_v61, %v5100_v43  ;;  %v3674_v37 = vrot.slane %v7096_v29, %v5174_v50  ;;  %v1732_v11 = vrot.slane %v1265_v63, %v5147_v27  ;;  %v1739_v43 = vrot.slane %v1265_v63, %v5150_v28 }
 0x167   : > { %v3260_v14 = vsel %vm7132_vm4, %v7144_v23, 0.0  ;;  %v1746_v16 = vrot.slane %v1265_v63, %v5153_v33  ;;  %v1753_v59 = vrot.slane %v1265_v63, %v5156_v34  ;;  %v3681_v62 = vrot.slane %v3667_v8, %v5174_v50  ;;  %v8295_v8 = vld [vmem:[#allocation22_spill] sm:$0xff] }
 0x168   : > { %v3261_v39 = vsel %vm7136_vm5, %v7150_v48, 0.0  ;;  %4880 = vxpose.xlu0.b32.cont [10/16] (narrow) %v4879_v46, 16  ;;  %v3683_v57 = vcombine.low %v3258_v55, %v3259_v7  ;;  %vm7176_vm6 = vcmp.eq.f32.partialorder %v8247_v49, %v1732_v11  ;;  %vm7181_vm7 = vcmp.eq.f32.partialorder %v8250_v26, %v1739_v43  ;;  %v7210_v11 = vpop.permute.xlu1 %4209 }
 0x169   : > { %vm7186_vm8 = vcmp.eq.f32.partialorder %v8254_v42, %v1746_v16  ;;  %vm7190_vm9 = vcmp.eq.f32.partialorder %v997_v52, %v1753_v59  ;;  %v8296_v49 = vrot.slane %v8295_v8, %v5174_v50  ;;  %v8298_v61 = vrot.slane %v8297_v24, %v5174_v50  ;;  %v7230_v16 = vpop.permute.xlu0 %4195 }
 0x16a   : > { %v1760_v26 = vrot.slane %v1269_v19, %v5147_v27  ;;  %v3684_v7 = vcombine.low %v3260_v14, %v3261_v39  ;;  %v3262_v42 = vsel %vm7176_vm6, %v8253_v58, 0.0  ;;  %v3263_v52 = vsel %vm7181_vm7, %v8259_v36, 0.0 }
 0x16b   : > { %v3920_v55 = vcombine.low %v8298_v61, %v8296_v49  ;;  %v3264_v46 = vsel %vm7186_vm8, %v8266_v0, 0.0  ;;  %v3265_v43 = vsel %vm7190_vm9, %v7060_v47, 0.0  ;;  %v1767_v14 = vrot.slane %v1269_v19, %v5150_v28 }
 0x16c   : > { %v1774_v58 = vrot.slane %v1269_v19, %v5153_v33  ;;  %vm7219_vm10 = vcmp.eq.f32.partialorder %v8188_v5, %v2215_v9  ;;  %vm7224_vm12 = vcmp.eq.f32.partialorder %v8193_v38, %v2222_v32  ;;  %v3691_v0 = vrot.slane %v3683_v57, %v5174_v50 }
 0x16d   : > { %v4881_v27 = vpack.i.bf16 %v3920_v55, %v7033_v45  ;;  %v1781_v47 = vrot.slane %v1269_v19, %v5156_v34  ;;  %vm7233_vm13 = vcmp.eq.f32.partialorder %v8271_v20, %v1760_v26  ;;  %vm7237_vm11 = vcmp.eq.f32.partialorder %v1005_v40, %v1767_v14  ;;  %v7276_v19 = vpop.permute.xlu1 %4197  ;;  %v7296_v57 = vpop.permute.xlu0 %4183 }
 0x16e   : > { %vm7241_vm14 = vcmp.eq.f32.partialorder %v1009_v35, %v1774_v58  ;;  %v3937_v34 = vcombine.low %v3929_v25, %v3936_v2  ;;  %v3698_v38 = vrot.slane %v3684_v7, %v5174_v50  ;;  %v3700_v45 = vcombine.low %v3262_v42, %v3263_v52  ;;  %v8320_v58 = vld [vmem:[#allocation2_spill] sm:$0xff] }
 0x16f   : > { %4882 = vxpose.xlu0.b32.cont [11/16] (narrow) %v4881_v27, 16  ;;  %v3701_v9 = vcombine.low %v3264_v46, %v3265_v43  ;;  %vm7252_vm15 = vcmp.eq.f32.partialorder %v1013_v4, %v1781_v47  ;;  %vm7257_vm0 = vcmp.eq.f32.partialorder %v6814_v1, %v2229_v41  ;;  %v3330_v44 = vsel %vm7128_vm3, %v8208_v3, 0.0  ;;  %v8313_v41 = vld [vmem:[#allocation81_spill] sm:$0xff] }
 0x170   : > { %v3682_v35 = vcombine.low %v3674_v37, %v3681_v62  ;;  %v4883_v17 = vpack.i.bf16 %v3937_v34, %v3665_v18  ;;  %v3266_v25 = vsel %vm7233_vm13, %v8286_v53, 0.0  ;;  %v3267_v2 = vsel %vm7237_vm11, %v7125_v56, 0.0  ;;  %v8314_v56 = vld [vmem:[#allocation68_spill] sm:$0xff]  ;;  %v8316_v53 = vld [vmem:[#allocation27_spill] sm:$0xff] }
 0x171   : > { %v3268_v1 = vsel %vm7241_vm14, %v7144_v23, 0.0  ;;  %v3269_v4 = vsel %vm7252_vm15, %v7150_v48, 0.0  ;;  %v3331_v3 = vsel %vm7219_vm10, %v8209_v15, 0.0  ;;  %v3332_v20 = vsel %vm7224_vm12, %v8313_v41, 0.0 }
 0x172   : > { %v8315_v31 = vrot.slane %v8314_v56, %v5174_v50  ;;  %v8317_v23 = vrot.slane %v8316_v53, %v5174_v50  ;;  %v4218_v48 = vmul.bf16 0, %v7210_v11  ;;  %v3333_v37 = vsel %vm7257_vm0, %v6838_v6, 0.0 }
 0x173   : > { %4884 = vxpose.xlu0.b32.cont [12/16] (narrow) %v4883_v17, 16  ;;  %v3699_v59 = vcombine.low %v3691_v0, %v3698_v38  ;;  %v3708_v15 = vrot.slane %v3700_v45, %v5174_v50  ;;  %v3715_v62 = vrot.slane %v3701_v9, %v5174_v50  ;;  %v3717_v29 = vcombine.low %v3266_v25, %v3267_v2 }
 0x174   : > { %v3954_v18 = vcombine.low %v8317_v23, %v8315_v31  ;;  %v3718_v21 = vcombine.low %v3268_v1, %v3269_v4  ;;  %4290 = vrot.lane.b32.xlu1 %v4218_v48, %s4929_s27  ;;  %v4206_v63 = vmul.bf16 0, %v7276_v19  ;;  %v3980_v8 = vrot.slane %v7035_v13, %v5174_v50 }
 0x175   : > { %v3987_v6 = vrot.slane %v7039_v10, %v5174_v50  ;;  %v3989_v49 = vcombine.low %v3330_v44, %v3331_v3  ;;  %v3990_v24 = vcombine.low %v3332_v20, %v3333_v37  ;;  %v3971_v61 = vcombine.low %v3963_v22, %v3970_v51  ;;  %v4172_v10 = vpop.permute.xlu0 %4171  ;;  %v7357_v44 = vpop.permute.xlu1 %4185 }
 0x176   : > { %v4885_v54 = vpack.i.bf16 %v3954_v18, %v3682_v35  ;;  %v3716_v55 = vcombine.low %v3708_v15, %v3715_v62  ;;  %v3725_v26 = vrot.slane %v3717_v29, %v5174_v50  ;;  %v3732_v7 = vrot.slane %v3718_v21, %v5174_v50 }
 0x177   : > { %v4887_v42 = vpack.i.bf16 %v3971_v61, %v3699_v59  ;;  %v4192_v13 = vmul.bf16 0, %v7296_v57  ;;  %v3997_v52 = vrot.slane %v3989_v49, %v5174_v50  ;;  %v4004_v60 = vrot.slane %v3990_v24, %v5174_v50  ;;  %v8319_v50 = vld [vmem:[#allocation3_spill] sm:$0xff] }
 0x178   : > { %4886 = vxpose.xlu0.b32.cont [13/16] (narrow) %v4885_v54, 16  ;;  %4278 = vrot.lane.b32.xlu1 %v4206_v63, %s4930_s28  ;;  %v3988_v46 = vcombine.low %v3980_v8, %v3987_v6  ;;  %v3733_v30 = vcombine.low %v3725_v26, %v3732_v7  ;;  %v4180_v51 = vmul.bf16 0, %v4172_v10  ;;  %v8318_v14 = vmov 0  }
 0x179   : > { %v4005_v43 = vcombine.low %v3997_v52, %v4004_v60  ;;  %vm4211_vm1 = vcmask 121856   ;;  %vm4199_vm2 = vcmask 7168   ;;  %vm4187_vm3 = vcmask 1039360   ;;  %v7370_v25 = vpop.permute.xlu1 %4173 }
 0x17a   : > { %v4889_v22 = vpack.i.bf16 %v3988_v46, %v3716_v55  ;;  %v7345_v45 = vsel %vm4211_vm1, %v7164_v12, %v7210_v11  ;;  %v7355_v40 = vsel %vm4199_vm2, %v7230_v16, %v7276_v19  ;;  %v7365_v35 = vsel %vm4187_vm3, %v7296_v57, %v7357_v44 }
 0x17b   : > { %v4891_v27 = vpack.i.bf16 %v4005_v43, %v3733_v30  ;;  %vm4175_vm4 = vcmask 924672   ;;  %vm4223_vm5 = vcmask 138240   ;;  %vm4147_vm6 = vcmask 908288  }
 0x17c   : > { %4888 = vxpose.xlu0.b32.cont [14/16] (narrow) %v4887_v42, 16  ;;  %4257 = vrot.lane.b32.xlu1 %v4192_v13, %s4931_s29  ;;  %v7376_v1 = vsel %vm4175_vm4, %v4172_v10, %v7370_v25  ;;  %vm4301_vm7 = vcmask 777216   ;;  %vm4280_vm8 = vcmask 900096   ;;  %vm4292_vm9 = vcmask 785408  }
 0x17d   : > { %v7378_v4 = vpop.permute.xlu1 %4219  ;;  %vm4251_vm10 = vcmask 1031168   ;;  %vm4263_vm12 = vcmask 916480   ;;  %vm4313_vm13 = vcmask 769024   ;;  %vm4420_vm11 = vcmask 130048  }
 0x180   : > { %4890 = vxpose.xlu0.b32.cont [15/16] (narrow) %v4889_v22, 16  ;;  %4245 = vrot.lane.b32.xlu1 %v4180_v51, %s4932_s30 }
 0x181   : > { %v4222_v41 = vpop.permute.xlu1 %4221 }
 0x182   : > { %v7390_v56 = vsel %vm4223_vm5, %v7378_v4, %v4222_v41  ;;  %v4230_v53 = vmul.bf16 0, %v4222_v41 }
 0x184   : > { %4892 = vxpose.xlu0.b32.end [16/16] (narrow) %v4891_v27, 16  ;;  %4234 = vrot.lane.b32.xlu1 %v8318_v14, %s4925_s23 }
 0x185   : > { %v7397_v23 = vpop.permute.xlu1 %4299 }
 0x188   : > { %4143 = vrot.lane.b32.xlu1 %v8319_v50, %s4933_s11 }
 0x1ad   : > { %4145 = vrot.lane.b32.xlu0 %v8320_v58, %s4933_s11 }
 0x1c4   : > { %v4893_v39 = vpop.trf.xlu0 }
 0x1c5   : > { %v4894_v0 = vunpack.i.l.bf16 %v4893_v39  ;;  %v4897_v5 = vunpack.i.h.bf16 %v4893_v39 }
 0x1c8   : > { %v4898_v36 = vpop.trf.xlu0 }
 0x1c9   : > { %v4899_v47 = vunpack.i.l.bf16 %v4898_v36  ;;  %v4902_v28 = vunpack.i.h.bf16 %v4898_v36 }
 0x1cb   : > { %v7324_v33 = vpack.c.bf16 %v4899_v47, %v4894_v0  ;;  %v7328_v34 = vpack.c.bf16 %v4902_v28, %v4897_v5  ;;  %v4467_v5 = vld [vmem:[%s7656_s5] sm:$0xff] }
 0x1cd   : > { %4295 = vrot.lane.b32.xlu1 %v7324_v33, %s4928_s26  ;;  %v4216_v38 = vmul.bf16 %v7164_v12, %v7324_v33  ;;  %v4217_v9 = vmul.bf16 %v7345_v45, %v7328_v34  ;;  %v4204_v32 = vmul.bf16 %v7230_v16, %v7324_v33  ;;  %v4205_v11 = vmul.bf16 %v7355_v40, %v7328_v34 }
 0x1ce   : > { %v4193_v17 = vmul.bf16 %v7365_v35, %v7324_v33  ;;  %v4194_v2 = vmul.bf16 %v7357_v44, %v7328_v34  ;;  %v4181_v19 = vmul.bf16 %v7376_v1, %v7324_v33  ;;  %v4182_v3 = vmul.bf16 %v7370_v25, %v7328_v34 }
 0x1cf   : > { %v4228_v20 = vmul.bf16 %v7378_v4, %v7324_v33  ;;  %v4229_v31 = vmul.bf16 %v7390_v56, %v7328_v34 }
 0x1d1   : > { %4297 = vrot.lane.b32.xlu1 %v7328_v34, %s4928_s26 }
 0x1d5   : > { %4266 = vrot.lane.b32.xlu1 %v7324_v33, %s4933_s11 }
 0x1d9   : > { %4268 = vrot.lane.b32.xlu1 %v7328_v34, %s4933_s11 }
 0x1dd   : > { %4236 = vrot.lane.b32.xlu1 %v7324_v33, %s4925_s23 }
 0x1e1   : > { %4238 = vrot.lane.b32.xlu1 %v7328_v34, %s4925_s23 }
 0x1e5   : > { %4286 = vrot.lane.b32.xlu1 %v4216_v38, %s4929_s27 }
 0x1e6   : > { %v7399_v18 = vpop.permute.xlu1 %4290 }
 0x1e9   : > { %4288 = vrot.lane.b32.xlu1 %v4217_v9, %s4929_s27  ;;  %v4483_v9 = vld [vmem:[%s7657_s6] sm:$0xff] }
 0x1ea   : > { %v7401_v48 = vpop.permute.xlu1 %4278 }
 0x1ed   : > { %4274 = vrot.lane.b32.xlu1 %v4204_v32, %s4930_s28 }
 0x1ee   : > { %v7403_v37 = vpop.permute.xlu1 %4257 }
 0x1f1   : > { %4276 = vrot.lane.b32.xlu1 %v4205_v11, %s4930_s28  ;;  %v4905_v11 = vld [vmem:[%s7655_s4 + $0x4] ss:$8 sps:$4 sm:$0xff]  }
 0x1f2   : > { %v7405_v59 = vpop.permute.xlu1 %4245  ;;  %4818 = vmatprep.mubr.msk.bf16.mxu0 %vm4420_vm11, %v4905_v11 }
 0x1f5   : > { %4259 = vrot.lane.b32.xlu1 %v4193_v17, %s4931_s29 }
 0x1f6   : > { %v7407_v15 = vpop.permute.xlu1 %4234 }
 0x1f9   : > { %4261 = vrot.lane.b32.xlu1 %v4194_v2, %s4931_s29 }
 0x1fa   : > { %v4144_v62 = vpop.permute.xlu1 %4143 }
 0x1fb   : > { %v4152_v36 = vmul.bf16 0, %v4144_v62 }
 0x1fd   : > { %4247 = vrot.lane.b32.xlu1 %v4181_v19, %s4932_s30  ;;  %v4468_v19 = vld [vmem:[%s7656_s5 + $0x8] sm:$0xff] }
 0x201   : > { %4249 = vrot.lane.b32.xlu1 %v4182_v3, %s4932_s30  ;;  %v4484_v3 = vld [vmem:[%s7657_s6 + $0x8] sm:$0xff] }
 0x205   : > { %4307 = vrot.lane.b32.xlu1 %v4228_v20, %s4934_s12 }
 0x209   : > { %4309 = vrot.lane.b32.xlu1 %v4229_v31, %s4934_s12 }
 0x20d   : > { %4311 = vrot.lane.b32.xlu1 %v4230_v53, %s4934_s12 }
 0x21f   : > { %v7429_v22 = vpop.permute.xlu0 %4145 }
 0x220   : > { %v7435_v43 = vsel %vm4147_vm6, %v4144_v62, %v7429_v22  ;;  %v4154_v17 = vmul.bf16 %v7429_v22, %v7328_v34 }
 0x221   : > { %v4153_v58 = vmul.bf16 %v7435_v43, %v7324_v33 }
 0x23f   : > { %v4296_v57 = vpop.permute.xlu1 %4295 }
 0x240   : > { %4372 = vrot.lane.b32.xlu1 %v4296_v57, %s4927_s25 }
 0x243   : > { %v4298_v29 = vpop.permute.xlu1 %4297 }
 0x244   : > { %v4302_v6 = vsel %vm4301_vm7, %v4296_v57, %v4298_v29  ;;  %v4303_v24 = vsel %vm4301_vm7, %v4298_v29, %v7397_v23 }
 0x247   : > { %v4267_v21 = vpop.permute.xlu1 %4266 }
 0x248   : > { %4354 = vrot.lane.b32.xlu0 %v4267_v21, %s4927_s25 }
 0x24b   : > { %v4269_v54 = vpop.permute.xlu1 %4268 }
 0x24c   : > { %4358 = vrot.lane.b32.xlu1 %v4269_v54, %s4927_s25  ;;  %v4270_v63 = vsel %vm4147_vm6, %v4267_v21, %v4269_v54 }
 0x24d   : > { %4356 = vrot.lane.b32.xlu0 %v4270_v63, %s4927_s25 }
 0x24f   : > { %v4237_v8 = vpop.permute.xlu1 %4236 }
 0x250   : > { %4374 = vrot.lane.b32.xlu1 %v4302_v6, %s4927_s25  ;;  %v4240_v32 = vsel %vm4187_vm3, %v7407_v15, %v4237_v8 }
 0x253   : > { %v4239_v49 = vpop.permute.xlu1 %4238 }
 0x254   : > { %4376 = vrot.lane.b32.xlu1 %v4303_v24, %s4927_s25  ;;  %v4241_v0 = vsel %vm4187_vm3, %v4237_v8, %v4239_v49 }
 0x257   : > { %v4287_v61 = vpop.permute.xlu1 %4286 }
 0x258   : > { %4366 = vrot.lane.b32.xlu1 %v4287_v61, %s4927_s25 }
 0x25b   : > { %v4289_v55 = vpop.permute.xlu1 %4288 }
 0x25c   : > { %v4293_v30 = vsel %vm4292_vm9, %v4287_v61, %v4289_v55  ;;  %v4294_v14 = vsel %vm4292_vm9, %v4289_v55, %v7399_v18 }
 0x25f   : > { %v4275_v26 = vpop.permute.xlu1 %4274 }
 0x260   : > { %4360 = vrot.lane.b32.xlu1 %v4275_v26, %s4927_s25 }
 0x263   : > { %v4277_v7 = vpop.permute.xlu1 %4276 }
 0x264   : > { %v4282_v52 = vsel %vm4280_vm8, %v4277_v7, %v7401_v48  ;;  %v4281_v39 = vsel %vm4280_vm8, %v4275_v26, %v4277_v7 }
 0x267   : > { %v4260_v42 = vpop.permute.xlu1 %4259 }
 0x268   : > { %v4264_v38 = vsel %vm4263_vm12, %v7403_v37, %v4260_v42 }
 0x26b   : > { %v4262_v13 = vpop.permute.xlu1 %4261 }
 0x26c   : > { %4352 = vrot.lane.b32.xlu0 %v4262_v13, %s4927_s25  ;;  %v4265_v28 = vsel %vm4263_vm12, %v4260_v42, %v4262_v13 }
 0x26f   : > { %v4248_v10 = vpop.permute.xlu1 %4247 }
 0x270   : > { %4364 = vrot.lane.b32.xlu0 %v4282_v52, %s4927_s25  ;;  %v4252_v27 = vsel %vm4251_vm10, %v7405_v59, %v4248_v10 }
 0x273   : > { %v4250_v60 = vpop.permute.xlu1 %4249 }
 0x274   : > { %4340 = vrot.lane.b32.xlu0 %v4239_v49, %s4927_s25  ;;  %4346 = vrot.lane.b32.xlu1 %v4250_v60, %s4927_s25  ;;  %v4253_v46 = vsel %vm4251_vm10, %v4248_v10, %v4250_v60 }
 0x277   : > { %v4308_v51 = vpop.permute.xlu1 %4307 }
 0x278   : > { %4344 = vrot.lane.b32.xlu0 %v4253_v46, %s4927_s25  ;;  %4368 = vrot.lane.b32.xlu1 %v4293_v30, %s4927_s25 }
 0x27b   : > { %v4310_v50 = vpop.permute.xlu1 %4309 }
 0x27c   : > { %4342 = vrot.lane.b32.xlu0 %v4252_v27, %s4927_s25  ;;  %4370 = vrot.lane.b32.xlu1 %v4294_v14, %s4927_s25  ;;  %v4314_v2 = vsel %vm4313_vm13, %v4308_v51, %v4310_v50 }
 0x27f   : > { %v7449_v47 = vpop.permute.xlu1 %4311 }
 0x280   : > { %4332 = vrot.lane.b32.xlu0 %v4153_v58, %s4927_s25  ;;  %4362 = vrot.lane.b32.xlu1 %v4281_v39, %s4927_s25  ;;  %v4315_v33 = vsel %vm4313_vm13, %v4310_v50, %v7449_v47 }
 0x284   : > { %4330 = vrot.lane.b32.xlu0 %v4152_v36, %s4927_s25  ;;  %4338 = vrot.lane.b32.xlu1 %v4241_v0, %s4927_s25 }
 0x288   : > { %4350 = vrot.lane.b32.xlu1 %v4265_v28, %s4927_s25  ;;  %4382 = vrot.lane.b32.xlu0 %v4315_v33, %s4927_s25 }
 0x28c   : > { %4348 = vrot.lane.b32.xlu1 %v4264_v38, %s4927_s25  ;;  %4471 = vperm.xlu0 %4859, %v4467_v5  }
 0x290   : > { %4336 = vrot.lane.b32.xlu1 %v4240_v32, %s4927_s25  ;;  %4487 = vperm.xlu0 %4859, %v4483_v9  }
 0x294   : > { %4334 = vrot.lane.b32.xlu1 %v4154_v17, %s4927_s25 }
 0x298   : > { %4380 = vrot.lane.b32.xlu1 %v4314_v2, %s4927_s25 }
 0x29c   : > { %4378 = vrot.lane.b32.xlu1 %v4308_v51, %s4927_s25 }
 0x2a0   : > { %4476 = vperm.xlu1 %4860, %v4468_v19  }
 0x2a4   : > { %4492 = vperm.xlu1 %4860, %v4484_v3  }
 0x2b2   : > { %v4373_v34 = vpop.permute.xlu1 %4372 }
 0x2ba   : > { %v4355_v57 = vpop.permute.xlu0 %4354 }
 0x2be   : > { %v4359_v41 = vpop.permute.xlu1 %4358 }
 0x2bf   : > { %v4357_v29 = vpop.permute.xlu0 %4356 }
 0x2c0   : > { %v4393_v52 = vsel %vm4223_vm5, %v4357_v29, %v4359_v41  ;;  %v4392_v30 = vsel %vm4223_vm5, %v4355_v57, %v4357_v29 }
 0x2c2   : > { %v4375_v20 = vpop.permute.xlu1 %4374 }
 0x2c3   : > { %v4398_v62 = vsel %vm4223_vm5, %v4373_v34, %v4375_v20  ;;  %v4903_v34 = vld [vmem:[%s7655_s4] ss:$8 sps:$4 sm:$0xff]  }
 0x2c6   : > { %v4377_v31 = vpop.permute.xlu1 %4376 }
 0x2c7   : > { %v4399_v53 = vsel %vm4223_vm5, %v4375_v20, %v4377_v31 }
 0x2c8   : > { %4424 = vmatprep.subr.bf16.mxu0 %v4399_v53 }
 0x2c9   : > { %4425 = vmatpush1.bf16.msra.mxu0 %v4398_v62 }
 0x2ca   : > { %v4367_v21 = vpop.permute.xlu1 %4366 }
 0x2d2   : > { %v4361_v63 = vpop.permute.xlu1 %4360 }
 0x2de   : > { %v4353_v54 = vpop.permute.xlu0 %4352 }
 0x2e2   : > { %v4365_v8 = vpop.permute.xlu0 %4364 }
 0x2e6   : > { %v4347_v6 = vpop.permute.xlu1 %4346  ;;  %v4341_v24 = vpop.permute.xlu0 %4340 }
 0x2ea   : > { %v4369_v49 = vpop.permute.xlu1 %4368  ;;  %v4345_v7 = vpop.permute.xlu0 %4344 }
 0x2eb   : > { %v4396_v26 = vsel %vm4223_vm5, %v4367_v21, %v4369_v49  ;;  %v4389_v39 = vsel %vm4223_vm5, %v4345_v7, %v4347_v6 }
 0x2ee   : > { %v4371_v61 = vpop.permute.xlu1 %4370  ;;  %v4343_v46 = vpop.permute.xlu0 %4342 }
 0x2ef   : > { %v4397_v55 = vsel %vm4223_vm5, %v4369_v49, %v4371_v61  ;;  %v4388_v0 = vsel %vm4223_vm5, %v4343_v46, %v4345_v7 }
 0x2f0   : > { %4426 = vmatprep.subr.bf16.mxu0 %v4397_v55 }
 0x2f1   : > { %4427 = vmatpush1.bf16.msra.mxu0 %v4396_v26 }
 0x2f2   : > { %v4363_v42 = vpop.permute.xlu1 %4362  ;;  %v4333_v14 = vpop.permute.xlu0 %4332 }
 0x2f3   : > { %v4395_v13 = vsel %vm4223_vm5, %v4363_v42, %v4365_v8  ;;  %v4394_v10 = vsel %vm4223_vm5, %v4361_v63, %v4363_v42 }
 0x2f4   : > { %4428 = vmatprep.subr.bf16.mxu0 %v4395_v13 }
 0x2f5   : > { %4429 = vmatpush1.bf16.msra.mxu0 %v4394_v10 }
 0x2f6   : > { %4430 = vmatprep.subr.bf16.mxu0 %v4393_v52  ;;  %v4339_v60 = vpop.permute.xlu1 %4338  ;;  %v7498_v28 = vpop.permute.xlu0 %4330 }
 0x2f7   : > { %v4387_v33 = vsel %vm4223_vm5, %v4339_v60, %v4341_v24  ;;  %v4384_v17 = vsel %vm4223_vm5, %v7498_v28, %v4333_v14 }
 0x2f9   : > { %4431 = vmatpush1.bf16.msra.mxu0 %v4392_v30 }
 0x2fa   : > { %v4351_v51 = vpop.permute.xlu1 %4350  ;;  %v4383_v32 = vpop.permute.xlu0 %4382 }
 0x2fb   : > { %v4391_v27 = vsel %vm4223_vm5, %v4351_v51, %v4353_v54 }
 0x2fc   : > { %4432 = vmatprep.subr.bf16.mxu0 %v4391_v27 }
 0x2fe   : > { %v4349_v50 = vpop.permute.xlu1 %4348 }
 0x2ff   : > { %v4390_v58 = vsel %vm4223_vm5, %v4349_v50, %v4351_v51 }
 0x300   : > { %4433 = vmatpush1.bf16.msra.mxu0 %v4390_v58 }
 0x301   : > { %4434 = vmatprep.subr.bf16.mxu0 %v4389_v39 }
 0x302   : > { %v4337_v36 = vpop.permute.xlu1 %4336 }
 0x303   : > { %v4386_v38 = vsel %vm4223_vm5, %v4337_v36, %v4339_v60 }
 0x304   : > { %4435 = vmatpush1.bf16.msra.mxu0 %v4388_v0 }
 0x305   : > { %4436 = vmatprep.subr.bf16.mxu0 %v4387_v33 }
 0x306   : > { %v4335_v5 = vpop.permute.xlu1 %4334 }
 0x307   : > { %v4385_v9 = vsel %vm4223_vm5, %v4333_v14, %v4335_v5  ;;  %v4472_v41 = vpop.permute.xlu0 %4471 }
 0x308   : > { %4437 = vmatpush1.bf16.msra.mxu0 %v4386_v38 }
 0x309   : > { %4438 = vmatprep.subr.bf16.mxu0 %v4385_v9 }
 0x30a   : > { %v4381_v11 = vpop.permute.xlu1 %4380 }
 0x30b   : > { %v4401_v2 = vsel %vm4223_vm5, %v4381_v11, %v4383_v32  ;;  %v4488_v29 = vpop.permute.xlu0 %4487 }
 0x30c   : > { %4439 = vmatpush1.bf16.msra.mxu0 %v4384_v17 }
 0x30d   : > { %4454 = vmatprep.subr.bf16.mxu0 %v4401_v2 }
 0x30e   : > { %v4379_v19 = vpop.permute.xlu1 %4378 }
 0x30f   : > { %v4400_v3 = vsel %vm4223_vm5, %v4379_v19, %v4381_v11 }
 0x310   : > { %4455 = vmatpush2.bf16.msra.mxu0 %v4400_v3 }
 0x313   : > { %4457 = vmatmul.mubr.bf16.vlgmr.msra.gmra.mxu0 %v4903_v34 }
 0x31b   : > { %v4477_v20 = vpop.permute.xlu1 %4476 }
 0x31f   : > { %v4493_v8 = vpop.permute.xlu1 %4492 }
 0x3d3   : > { %v4458_v31 = vpop.f32.mrf.mxu0 }
 0x3d4   : > { %v4479_v53 = vmul.f32 %v4472_v41, %v4458_v31 }
 0x3d5   : > { %v4460_v62 = vpop.f32.mrf.mxu0 }
 0x3d6   : > { %v4480_v57 = vmul.f32 %v4472_v41, %v4460_v62  ;;  %v4495_v54 = vadd.f32 %v4488_v29, %v4479_v53 }
 0x3d7   : > { %v4462_v21 = vpop.f32.mrf.mxu0 }
 0x3d8   : > { %v4481_v63 = vmul.f32 %v4477_v20, %v4462_v21  ;;  %v4496_v49 = vadd.f32 %v4488_v29, %v4480_v57  ;;  %v4499_v55 = vmax.f32 %v4495_v54, 0.0  ;;  %v4717_v29 = vld [vmem:[%s7659_s8] sm:$0xff] }
 0x3d9   : > { %v4464_v6 = vpop.f32.mrf.mxu0 }
 0x3da   : > { %v4497_v24 = vadd.f32 %v4493_v8, %v4481_v63  ;;  %v4482_v61 = vmul.f32 %v4477_v20, %v4464_v6  ;;  %v4500_v42 = vmax.f32 %v4496_v49, 0.0  ;;  %v7601_v20 = vld [vmem:[%s7658_s7] sm:$0xff] }
 0x3db   : > { %v4820_v31 = vcombine.high %v7601_v20, %v7601_v20 }
 0x3dc   : > { %v4501_v26 = vmax.f32 %v4497_v24, 0.0  ;;  %v4498_v7 = vadd.f32 %v4493_v8, %v4482_v61 }
 0x3dd   : > { %4821 = vmatprep.mubr.msk.bf16.mxu1 %vm4420_vm11, %v4820_v31 }
 0x3de   : > { %v7510_v13 = vpack.c.bf16 %v4501_v26, %v4499_v55  ;;  %v4502_v10 = vmax.f32 %v4498_v7, 0.0 }
 0x3e0   : > { %v7512_v52 = vpack.c.bf16 %v4502_v10, %v4500_v42  ;;  %4562 = vrot.lane.b32.xlu0 %v7510_v13, %s4928_s26  ;;  %v4513_v60 = vmul.bf16 %v7510_v13, %v7164_v12  ;;  %v4511_v30 = vmul.bf16 %v7510_v13, %v7230_v16  ;;  %v4509_v12 = vmul.bf16 %v7510_v13, %v7365_v35 }
 0x3e2   : > { %4564 = vrot.lane.b32.xlu1 %v7512_v52, %s4928_s26  ;;  %v4514_v46 = vmul.bf16 %v7512_v52, %v7345_v45  ;;  %v4512_v51 = vmul.bf16 %v7512_v52, %v7355_v40  ;;  %v4510_v16 = vmul.bf16 %v7512_v52, %v7357_v44  ;;  %v4507_v45 = vmul.bf16 %v7510_v13, %v7376_v1 }
 0x3e3   : > { %v4508_v40 = vmul.bf16 %v7512_v52, %v7370_v25  ;;  %v4515_v44 = vmul.bf16 %v7510_v13, %v7378_v4  ;;  %v4516_v35 = vmul.bf16 %v7512_v52, %v7390_v56 }
 0x3e4   : > { %4556 = vrot.lane.b32.xlu0 %v4513_v60, %s4929_s27 }
 0x3e6   : > { %4558 = vrot.lane.b32.xlu1 %v4514_v46, %s4929_s27 }
 0x3e8   : > { %4548 = vrot.lane.b32.xlu0 %v4511_v30, %s4930_s28 }
 0x3ea   : > { %4550 = vrot.lane.b32.xlu1 %v4512_v51, %s4930_s28 }
 0x3ec   : > { %4541 = vrot.lane.b32.xlu0 %v7510_v13, %s4933_s11 }
 0x3ee   : > { %4543 = vrot.lane.b32.xlu1 %v7512_v52, %s4933_s11 }
 0x3f0   : > { %4535 = vrot.lane.b32.xlu0 %v4509_v12, %s4931_s29 }
 0x3f2   : > { %4537 = vrot.lane.b32.xlu1 %v4510_v16, %s4931_s29 }
 0x3f4   : > { %4527 = vrot.lane.b32.xlu0 %v4507_v45, %s4932_s30 }
 0x3f6   : > { %4529 = vrot.lane.b32.xlu1 %v4508_v40, %s4932_s30 }
 0x3f8   : > { %4519 = vrot.lane.b32.xlu0 %v7510_v13, %s4925_s23 }
 0x3fa   : > { %4521 = vrot.lane.b32.xlu1 %v7512_v52, %s4925_s23 }
 0x3fc   : > { %4570 = vrot.lane.b32.xlu0 %v4515_v44, %s4934_s12 }
 0x3fe   : > { %4572 = vrot.lane.b32.xlu1 %v4516_v35, %s4934_s12  ;;  %s379_s12 = scalar_lea.vmem %s7661_s10, %s4824_s15 }
 0x452   : > { %v4563_v1 = vpop.permute.xlu0 %4562 }
 0x453   : > { %4625 = vrot.lane.b32.xlu0 %v4563_v1, %s4927_s25 }
 0x454   : > { %v4565_v25 = vpop.permute.xlu1 %4564 }
 0x455   : > { %v4566_v56 = vsel %vm4301_vm7, %v4563_v1, %v4565_v25  ;;  %v4567_v36 = vsel %vm4301_vm7, %v4565_v25, %v7397_v23 }
 0x456   : > { %v4557_v27 = vpop.permute.xlu0 %4556 }
 0x458   : > { %v4559_v14 = vpop.permute.xlu1 %4558 }
 0x459   : > { %v4561_v0 = vsel %vm4292_vm9, %v4559_v14, %v7399_v18  ;;  %v4560_v32 = vsel %vm4292_vm9, %v4557_v27, %v4559_v14 }
 0x45a   : > { %v4549_v50 = vpop.permute.xlu0 %4548 }
 0x45b   : > { %4613 = vrot.lane.b32.xlu0 %v4549_v50, %s4927_s25 }
 0x45c   : > { %v4551_v58 = vpop.permute.xlu1 %4550 }
 0x45d   : > { %v4552_v5 = vsel %vm4280_vm8, %v4549_v50, %v4551_v58  ;;  %v4553_v18 = vsel %vm4280_vm8, %v4551_v58, %v7401_v48 }
 0x45e   : > { %v4542_v39 = vpop.permute.xlu0 %4541 }
 0x45f   : > { %4607 = vrot.lane.b32.xlu1 %v4542_v39, %s4927_s25 }
 0x460   : > { %v4544_v4 = vpop.permute.xlu1 %4543 }
 0x461   : > { %4611 = vrot.lane.b32.xlu0 %v4544_v4, %s4927_s25  ;;  %v4545_v33 = vsel %vm4147_vm6, %v4542_v39, %v4544_v4 }
 0x462   : > { %v4536_v38 = vpop.permute.xlu0 %4535 }
 0x463   : > { %4619 = vrot.lane.b32.xlu1 %v4557_v27, %s4927_s25  ;;  %v4539_v23 = vsel %vm4263_vm12, %v7403_v37, %v4536_v38 }
 0x464   : > { %v4538_v9 = vpop.permute.xlu1 %4537 }
 0x465   : > { %4627 = vrot.lane.b32.xlu0 %v4566_v56, %s4927_s25  ;;  %v4540_v2 = vsel %vm4263_vm12, %v4536_v38, %v4538_v9 }
 0x466   : > { %v4528_v17 = vpop.permute.xlu0 %4527 }
 0x467   : > { %4629 = vrot.lane.b32.xlu1 %v4567_v36, %s4927_s25  ;;  %v4531_v37 = vsel %vm4251_vm10, %v7405_v59, %v4528_v17  ;;  %v4506_v59 = vmul.bf16 %v7512_v52, %v7429_v22 }
 0x468   : > { %v4530_v11 = vpop.permute.xlu1 %4529 }
 0x469   : > { %4623 = vrot.lane.b32.xlu0 %v4561_v0, %s4927_s25  ;;  %v4532_v34 = vsel %vm4251_vm10, %v4528_v17, %v4530_v11 }
 0x46a   : > { %v4520_v3 = vpop.permute.xlu0 %4519 }
 0x46b   : > { %4609 = vrot.lane.b32.xlu1 %v4545_v33, %s4927_s25  ;;  %v4523_v41 = vsel %vm4187_vm3, %v7407_v15, %v4520_v3  ;;  %v4505_v15 = vmul.bf16 %v7510_v13, %v7435_v43  ;;  %v4725_v43 = vld [vmem:[%s7660_s9] sm:$0xff] }
 0x46c   : > { %v4522_v19 = vpop.permute.xlu1 %4521 }
 0x46d   : > { %4615 = vrot.lane.b32.xlu0 %v4552_v5, %s4927_s25  ;;  %v4524_v48 = vsel %vm4187_vm3, %v4520_v3, %v4522_v19 }
 0x46e   : > { %v4571_v62 = vpop.permute.xlu0 %4570 }
 0x46f   : > { %4621 = vrot.lane.b32.xlu1 %v4560_v32, %s4927_s25 }
 0x470   : > { %v4573_v53 = vpop.permute.xlu1 %4572 }
 0x471   : > { %4601 = vrot.lane.b32.xlu0 %v4539_v23, %s4927_s25  ;;  %v4575_v22 = vsel %vm4313_vm13, %v4573_v53, %v7449_v47  ;;  %v4574_v57 = vsel %vm4313_vm13, %v4571_v62, %v4573_v53 }
 0x473   : > { %4617 = vrot.lane.b32.xlu1 %v4553_v18, %s4927_s25 }
 0x475   : > { %4599 = vrot.lane.b32.xlu0 %v4530_v11, %s4927_s25  ;;  %v4819_v11 = vcombine.low %v7601_v20, %v7601_v20 }
 0x477   : > { %4605 = vrot.lane.b32.xlu1 %v4538_v9, %s4927_s25 }
 0x479   : > { %4603 = vrot.lane.b32.xlu0 %v4540_v2, %s4927_s25 }
 0x47b   : > { %4595 = vrot.lane.b32.xlu1 %v4531_v37, %s4927_s25 }
 0x47d   : > { %4591 = vrot.lane.b32.xlu0 %v4524_v48, %s4927_s25 }
 0x47f   : > { %4597 = vrot.lane.b32.xlu1 %v4532_v34, %s4927_s25 }
 0x481   : > { %4589 = vrot.lane.b32.xlu0 %v4523_v41, %s4927_s25 }
 0x483   : > { %4593 = vrot.lane.b32.xlu1 %v4522_v19, %s4927_s25 }
 0x485   : > { %4587 = vrot.lane.b32.xlu0 %v4506_v59, %s4927_s25 }
 0x487   : > { %4585 = vrot.lane.b32.xlu1 %v4505_v15, %s4927_s25 }
 0x489   : > { %4635 = vrot.lane.b32.xlu0 %v4575_v22, %s4927_s25 }
 0x48b   : > { %4633 = vrot.lane.b32.xlu1 %v4574_v57, %s4927_s25 }
 0x48d   : > { %4720 = vperm.xlu0 %4859, %v4717_v29  }
 0x48f   : > { %4631 = vrot.lane.b32.xlu1 %v4571_v62, %s4927_s25 }
 0x493   : > { %4728 = vperm.xlu1 %4860, %v4725_v43  }
 0x4c5   : > { %v4626_v47 = vpop.permute.xlu0 %4625 }
 0x4cd   : > { %v4614_v21 = vpop.permute.xlu0 %4613 }
 0x4d1   : > { %v4608_v54 = vpop.permute.xlu1 %4607 }
 0x4d3   : > { %v4612_v63 = vpop.permute.xlu0 %4611 }
 0x4d5   : > { %v4620_v8 = vpop.permute.xlu1 %4619 }
 0x4d7   : > { %v4628_v6 = vpop.permute.xlu0 %4627 }
 0x4d8   : > { %v4651_v55 = vsel %vm4223_vm5, %v4626_v47, %v4628_v6 }
 0x4d9   : > { %v4630_v49 = vpop.permute.xlu1 %4629 }
 0x4da   : > { %v4652_v24 = vsel %vm4223_vm5, %v4628_v6, %v4630_v49 }
 0x4db   : > { %4676 = vmatprep.subr.bf16.mxu1 %v4652_v24  ;;  %v4624_v61 = vpop.permute.xlu0 %4623 }
 0x4dc   : > { %4677 = vmatpush1.bf16.msra.mxu1 %v4651_v55 }
 0x4dd   : > { %v4610_v26 = vpop.permute.xlu1 %4609 }
 0x4de   : > { %v4646_v12 = vsel %vm4223_vm5, %v4610_v26, %v4612_v63  ;;  %v4645_v40 = vsel %vm4223_vm5, %v4608_v54, %v4610_v26 }
 0x4df   : > { %v4616_v7 = vpop.permute.xlu0 %4615 }
 0x4e0   : > { %v4647_v51 = vsel %vm4223_vm5, %v4614_v21, %v4616_v7 }
 0x4e1   : > { %v4622_v42 = vpop.permute.xlu1 %4621 }
 0x4e2   : > { %v4650_v13 = vsel %vm4223_vm5, %v4622_v42, %v4624_v61  ;;  %v4649_v10 = vsel %vm4223_vm5, %v4620_v8, %v4622_v42 }
 0x4e3   : > { %4678 = vmatprep.subr.bf16.mxu1 %v4650_v13  ;;  %v4602_v52 = vpop.permute.xlu0 %4601 }
 0x4e4   : > { %4679 = vmatpush1.bf16.msra.mxu1 %v4649_v10 }
 0x4e5   : > { %v4618_v60 = vpop.permute.xlu1 %4617 }
 0x4e6   : > { %v4648_v46 = vsel %vm4223_vm5, %v4616_v7, %v4618_v60 }
 0x4e7   : > { %4680 = vmatprep.subr.bf16.mxu1 %v4648_v46  ;;  %v4600_v30 = vpop.permute.xlu0 %4599 }
 0x4e8   : > { %4681 = vmatpush1.bf16.msra.mxu1 %v4647_v51 }
 0x4e9   : > { %v4606_v16 = vpop.permute.xlu1 %4605  ;;  %4682 = vmatprep.subr.bf16.mxu1 %v4646_v12 }
 0x4eb   : > { %v4604_v45 = vpop.permute.xlu0 %4603 }
 0x4ec   : > { %4683 = vmatpush1.bf16.msra.mxu1 %v4645_v40  ;;  %v4644_v44 = vsel %vm4223_vm5, %v4604_v45, %v4606_v16  ;;  %v4643_v25 = vsel %vm4223_vm5, %v4602_v52, %v4604_v45 }
 0x4ed   : > { %v4596_v35 = vpop.permute.xlu1 %4595  ;;  %4684 = vmatprep.subr.bf16.mxu1 %v4644_v44 }
 0x4ef   : > { %v4592_v1 = vpop.permute.xlu0 %4591 }
 0x4f0   : > { %4685 = vmatpush1.bf16.msra.mxu1 %v4643_v25 }
 0x4f1   : > { %v4598_v27 = vpop.permute.xlu1 %4597 }
 0x4f2   : > { %v4642_v14 = vsel %vm4223_vm5, %v4598_v27, %v4600_v30  ;;  %v4641_v50 = vsel %vm4223_vm5, %v4596_v35, %v4598_v27 }
 0x4f3   : > { %4686 = vmatprep.subr.bf16.mxu1 %v4642_v14  ;;  %v4590_v58 = vpop.permute.xlu0 %4589 }
 0x4f4   : > { %4687 = vmatpush1.bf16.msra.mxu1 %v4641_v50  ;;  %v4639_v36 = vsel %vm4223_vm5, %v4590_v58, %v4592_v1 }
 0x4f5   : > { %v4594_v39 = vpop.permute.xlu1 %4593 }
 0x4f6   : > { %v4640_v4 = vsel %vm4223_vm5, %v4592_v1, %v4594_v39 }
 0x4f7   : > { %4688 = vmatprep.subr.bf16.mxu1 %v4640_v4  ;;  %v4588_v56 = vpop.permute.xlu0 %4587 }
 0x4f8   : > { %4689 = vmatpush1.bf16.msra.mxu1 %v4639_v36 }
 0x4f9   : > { %v4586_v0 = vpop.permute.xlu1 %4585 }
 0x4fa   : > { %v4638_v33 = vsel %vm4223_vm5, %v4586_v0, %v4588_v56  ;;  %v4637_v5 = vsel %vm4223_vm5, %v7498_v28, %v4586_v0 }
 0x4fb   : > { %4690 = vmatprep.subr.bf16.mxu1 %v4638_v33  ;;  %v4636_v38 = vpop.permute.xlu0 %4635 }
 0x4fc   : > { %4691 = vmatpush1.bf16.msra.mxu1 %v4637_v5 }
 0x4fd   : > { %v4634_v9 = vpop.permute.xlu1 %4633 }
 0x4fe   : > { %v4654_v32 = vsel %vm4223_vm5, %v4634_v9, %v4636_v38 }
 0x4ff   : > { %4706 = vmatprep.subr.bf16.mxu1 %v4654_v32 }
 0x501   : > { %v4632_v23 = vpop.permute.xlu1 %4631 }
 0x502   : > { %v4653_v18 = vsel %vm4223_vm5, %v4632_v23, %v4634_v9 }
 0x503   : > { %4707 = vmatpush2.bf16.msra.mxu1 %v4653_v18 }
 0x506   : > { %4709 = vmatmul.mubr.bf16.vlgmr.msra.gmra.mxu1 %v4819_v11 }
 0x508   : > { %v4721_v17 = vpop.permute.xlu0 %4720 }
 0x50e   : > { %v4729_v28 = vpop.permute.xlu1 %4728 }
 0x5c6   : > { %v4710_v2 = vpop.f32.mrf.mxu1 }
 0x5c7   : > { %v4723_v19 = vmul.f32 %v4721_v17, %v4710_v2 }
 0x5c8   : > { %v4712_v37 = vpop.f32.mrf.mxu1 }
 0x5c9   : > { %v4731_v3 = vadd.f32 %v4729_v28, %v4723_v19  ;;  %v4724_v48 = vmul.f32 %v4721_v17, %v4712_v37 }
 0x5ca   : > { %v4714_v34 = vpop.f32.mrf.mxu1 }
 0x5cb   : > { %v4733_v41 = vmax.f32 %v4731_v3, 0.0  ;;  %v4732_v59 = vadd.f32 %v4729_v28, %v4724_v48 }
 0x5cc   : > { %v4715_v31 = vpop.f32.mrf.mxu1 }
 0x5cd   : > { %4735 = vst [vmem:[%s379_s12] sm:$0xff] %v4733_v41  ;;  %v4734_v20 = vmax.f32 %v4732_v59, 0.0 }
 0x5cf   : > { %4736 = vst [vmem:[%s379_s12 + $0x8] sm:$0xff] %v4734_v20 }
 0x5d0 PF: > { %s20_s13 = sadd.s32 1, %s4914_s13  }
 0x5d1   : > { %p17_p4 = scmp.ge.s32.totalorder %s20_s13, 4  }
 0x5d3   :  { %19 = sbr.rel (!%p17_p4) target bundleno = 1 (0x1), region = 93 }

</bundles_post_ra>
